<compile_context>
chip_gen: v7x
topology: tpu7x:2x2x1
jax: 0.10.0
libtpu: 0.0.40
codegen_flags: <defaults>
</compile_context>

<pallas_src>
import functools

import jax
import jax.numpy as jnp
from jax.experimental import pallas as pl
from jax.experimental.pallas import tpu as pltpu

_NEG_SLOPE = 0.2
_BN_EPS = 1e-5
# Fits under v5e/v6e (128 MiB) and v7x (64 MiB) physical VMEM with headroom; well
# above the 16/32 MiB scoped defaults.
_VMEM_LIMIT = 48 * 1024 * 1024


def _leaky(y):
    return jnp.where(y >= 0, y, _NEG_SLOPE * y)


# ---------------------------------------------------------------------------
# Wrapper-side, compute-free preprocessing (weights + im2col data movement)
# ---------------------------------------------------------------------------
def _conv_weight_matrix(w):
    """Torch conv weight (Cout, Cin, KH, KW) -> (KH*KW*Cin, Cout) matmul weight.
    Row order is tap-major / channel-minor, matching _extract_patches columns."""
    cout, cin, kh, kw = w.shape
    return jnp.transpose(w, (2, 3, 1, 0)).reshape(kh * kw * cin, cout)


def _extract_patches(a, kh, kw, stride, pad):
    """NHWC activation -> im2col patch matrix (N*OH*OW, KH*KW*C).

    Pure data movement (pad + static strided slices + stack); all FLOPs stay in
    the Pallas kernels."""
    n, h, w, c = a.shape
    oh = (h + 2 * pad - kh) // stride + 1
    ow = (w + 2 * pad - kw) // stride + 1
    if pad:
        a = jnp.pad(a, ((0, 0), (pad, pad), (pad, pad), (0, 0)))
    taps = []
    for ki in range(kh):
        for kj in range(kw):
            taps.append(a[:, ki:ki + stride * (oh - 1) + 1:stride,
                           kj:kj + stride * (ow - 1) + 1:stride, :])
    p = jnp.stack(taps, axis=3)                       # (N, OH, OW, KK, C)
    return p.reshape(n * oh * ow, kh * kw * c), oh, ow


# ---------------------------------------------------------------------------
# Kernels
# ---------------------------------------------------------------------------
def _conv_lrelu_kernel(p_ref, w_ref, o_ref):
    # Initial conv (no BN): one MXU matmul + f32 LeakyReLU epilogue per row tile.
    y = jnp.dot(p_ref[...], w_ref[...], preferred_element_type=jnp.float32)
    o_ref[...] = _leaky(y).astype(o_ref.dtype)


def _conv_bn_lrelu_kernel(p_ref, w_ref, g_ref, b_ref, o_ref, *, n_rows):
    # Pyramid conv + exact training-mode BatchNorm2d + LeakyReLU.
    # Rows = all N*OH*OW positions, columns = this grid step's channel block, so
    # BN stats are whole-batch exact and need no pooling matmuls.
    y = jnp.dot(p_ref[...], w_ref[...], preferred_element_type=jnp.float32)
    cnt = jnp.float32(n_rows)
    mean = jnp.sum(y, axis=0, keepdims=True) / cnt
    d = y - mean
    var = jnp.sum(d * d, axis=0, keepdims=True) / cnt     # two-pass (stable) variance
    inv = jax.lax.rsqrt(var + _BN_EPS)
    a = d * (g_ref[...] * inv) + b_ref[...]
    o_ref[...] = _leaky(a).astype(o_ref.dtype)


def _tail_kernel(p_ref, z_ref, ut_ref, wx_ref, bx_ref, wa2_ref, ba_ref,
                 wc_ref, bc_ref, feat_ref, clas_ref):
    # Fused tail: [final conv composed with transA feat-half] + transX + transA
    # + clas Linear + exact Sigmoid.  No in-kernel concat: transA(cat(f0, zt)) =
    # f0 @ WA1^T + zt @ WA2^T + b, and f0 @ WA1^T folds into U_tail.
    zt = _leaky(jnp.dot(z_ref[...], wx_ref[...],
                        preferred_element_type=jnp.float32) + bx_ref[...])
    feat = (jnp.dot(p_ref[...], ut_ref[...], preferred_element_type=jnp.float32)
            + jnp.dot(zt.astype(wa2_ref.dtype), wa2_ref[...],
                      preferred_element_type=jnp.float32)
            + ba_ref[...])
    feat_ref[...] = feat                                   # lane-dense (tb, 1024) store
    t = jnp.sum(feat * wc_ref[...], axis=1, keepdims=True) + bc_ref[...]
    sig = 1.0 / (1.0 + jnp.exp(-t))                        # exact sigmoid
    clas_ref[...] = jnp.broadcast_to(sig, clas_ref.shape)  # lane-dense 128-wide slab


# ---------------------------------------------------------------------------
# pallas_call wrappers
# ---------------------------------------------------------------------------
def _call_conv0(patches, w_mat):
    r, k = patches.shape
    cout = w_mat.shape[1]
    # 256-row tiles (good for v6e/v7x; >=128 also saturates v5e's MXU rows); row
    # count N*isize^2/4 is always a multiple of 64.
    tm = next((t for t in (256, 128, 64) if r % t == 0), r)
    cost = pl.CostEstimate(flops=2 * r * k * cout, transcendentals=0,
                           bytes_accessed=2 * (patches.size + w_mat.size + r * cout))
    return pl.pallas_call(
        _conv_lrelu_kernel,
        out_shape=jax.ShapeDtypeStruct((r, cout), jnp.bfloat16),
        grid=(r // tm,),
        in_specs=[pl.BlockSpec((tm, k), lambda i: (i, 0)),      # pipelined patch tiles
                  pl.BlockSpec((k, cout), lambda i: (0, 0))],   # VMEM-resident weight
        out_specs=pl.BlockSpec((tm, cout), lambda i: (i, 0)),
        compiler_params=pltpu.CompilerParams(
            dimension_semantics=("parallel",), vmem_limit_bytes=_VMEM_LIMIT),
        cost_estimate=cost,
    )(patches, w_mat)


def _call_pyramid(patches, w_mat, gamma, beta):
    r, k = patches.shape
    cout = w_mat.shape[1]
    tc = 128 if cout % 128 == 0 else cout         # column (channel) tile
    cost = pl.CostEstimate(flops=2 * r * k * cout + 8 * r * cout,
                           transcendentals=cout,
                           bytes_accessed=2 * (patches.size + w_mat.size + r * cout))
    kernel = functools.partial(_conv_bn_lrelu_kernel, n_rows=r)
    return pl.pallas_call(
        kernel,
        out_shape=jax.ShapeDtypeStruct((r, cout), jnp.bfloat16),
        grid=(cout // tc,),
        in_specs=[pl.BlockSpec((r, k), lambda j: (0, 0)),       # resident patches
                  pl.BlockSpec((k, tc), lambda j: (0, j)),      # weight column block
                  pl.BlockSpec((1, tc), lambda j: (0, j)),
                  pl.BlockSpec((1, tc), lambda j: (0, j))],
        out_specs=pl.BlockSpec((r, tc), lambda j: (0, j)),
        compiler_params=pltpu.CompilerParams(
            dimension_semantics=("parallel",), vmem_limit_bytes=_VMEM_LIMIT),
        cost_estimate=cost,
    )(patches, w_mat, gamma, beta)


def _call_tail(p_fin, z, u_tail, wx_t, bx, wa2_t, ba, wc, bc):
    n, kf = p_fin.shape
    nz = z.shape[1]
    hx = wx_t.shape[1]
    hidden = u_tail.shape[1]
    tb = next((t for t in (256, 128) if n % t == 0), n)
    cost = pl.CostEstimate(
        flops=2 * n * (kf * hidden + nz * hx + hx * hidden + hidden),
        transcendentals=n,
        bytes_accessed=2 * (p_fin.size + z.size + u_tail.size + wa2_t.size)
                       + 4 * (n * hidden + n * 128))
    return pl.pallas_call(
        _tail_kernel,
        out_shape=(jax.ShapeDtypeStruct((n, hidden), jnp.float32),
                   jax.ShapeDtypeStruct((n, 128), jnp.float32)),
        grid=(n // tb,),
        in_specs=[pl.BlockSpec((tb, kf), lambda i: (i, 0)),
                  pl.BlockSpec((tb, nz), lambda i: (i, 0)),
                  pl.BlockSpec((kf, hidden), lambda i: (0, 0)),
                  pl.BlockSpec((nz, hx), lambda i: (0, 0)),
                  pl.BlockSpec((1, hx), lambda i: (0, 0)),
                  pl.BlockSpec((hx, hidden), lambda i: (0, 0)),
                  pl.BlockSpec((1, hidden), lambda i: (0, 0)),
                  pl.BlockSpec((1, hidden), lambda i: (0, 0)),
                  pl.BlockSpec((1, 1), lambda i: (0, 0))],
        out_specs=(pl.BlockSpec((tb, hidden), lambda i: (i, 0)),
                   pl.BlockSpec((tb, 128), lambda i: (i, 0))),
        compiler_params=pltpu.CompilerParams(
            dimension_semantics=("parallel",), vmem_limit_bytes=_VMEM_LIMIT),
        cost_estimate=cost,
    )(p_fin, z, u_tail, wx_t, bx, wa2_t, ba, wc, bc)


# ---------------------------------------------------------------------------
# Forward wrapper
# ---------------------------------------------------------------------------
def egbad_discriminator_forward(z, x, params):
    n, nc, h, w = x.shape
    nz = z.shape[1]

    # ---- weight preprocessing: O(weight size), all tiny --------------------
    w0 = _conv_weight_matrix(params["conv0"]).astype(jnp.bfloat16)
    pyr = []
    for (wgt, gamma, beta) in params["pyramid"]:
        cout = wgt.shape[0]
        pyr.append((_conv_weight_matrix(wgt).astype(jnp.bfloat16),
                    gamma.reshape(1, cout).astype(jnp.float32),
                    beta.reshape(1, cout).astype(jnp.float32)))
    wfin = _conv_weight_matrix(params["final"])               # (16*C_last, nz) f32
    wa = params["transA_w"]                                   # (1024, 512+nz)
    # Final conv (no bias, no nonlinearity before transA) composed with transA's
    # first nz input columns.
    u_tail = jnp.dot(wfin, jnp.transpose(wa[:, :nz])).astype(jnp.bfloat16)
    wx_t = jnp.transpose(params["transX_w"]).astype(jnp.bfloat16)   # (nz, 512)
    bx = params["transX_b"].reshape(1, -1).astype(jnp.float32)
    wa2_t = jnp.transpose(wa[:, nz:]).astype(jnp.bfloat16)          # (512, 1024)
    ba = params["transA_b"].reshape(1, -1).astype(jnp.float32)
    wc = params["clas_w"].reshape(1, -1).astype(jnp.float32)
    bc = params["clas_b"].reshape(1, 1).astype(jnp.float32)

    # ---- stage 0: initial conv + LeakyReLU (row-tiled, megacore-parallel) ---
    x_nhwc = jnp.transpose(x, (0, 2, 3, 1)).astype(jnp.bfloat16)    # bf16 pre-cast
    p0, oh, ow = _extract_patches(x_nhwc, 4, 4, 2, 1)
    a = _call_conv0(p0, w0).reshape(n, oh, ow, w0.shape[1])

    # ---- pyramid stages: conv + exact whole-batch BN + LeakyReLU ------------
    for (w_mat, gamma, beta) in pyr:
        p, oh, ow = _extract_patches(a, 4, 4, 2, 1)
        a = _call_pyramid(p, w_mat, gamma, beta).reshape(n, oh, ow, w_mat.shape[1])

    # ---- fused tail: final conv (+transA) + transX + transA + clas ----------
    p_fin, _, _ = _extract_patches(a, 4, 4, 1, 0)       # (N, 16*C_last) == reshape
    feat, clas_pad = _call_tail(p_fin, z.astype(jnp.bfloat16), u_tail, wx_t, bx,
                                wa2_t, ba, wc, bc)
    clas = clas_pad[:, 0]                               # .view(-1, 1).squeeze(1)
    return clas, feat                                   # feat is transA output (N, 1024)


# ---------------------------------------------------------------------------
# Deterministic parameter construction (conv weights N(0, 0.02), BN gamma=1/beta=0)
# ---------------------------------------------------------------------------
def init_params(key, isize, nc, ndf, nz):
    assert isize % 16 == 0, "isize has to be a multiple of 16"
    ks = list(jax.random.split(key, 32))

    def nrm(k, shape, scale=0.02):
        return scale * jax.random.normal(k, shape, jnp.float32)

    i = 0
    p = {}
    p["conv0"] = nrm(ks[i], (ndf, nc, 4, 4)); i += 1
    csize, cndf = isize // 2, ndf
    pyramid = []
    while csize > 4:
        wgt = nrm(ks[i], (cndf * 2, cndf, 4, 4)); i += 1
        gamma = jnp.ones((cndf * 2,), jnp.float32)
        beta = jnp.zeros((cndf * 2,), jnp.float32)
        pyramid.append((wgt, gamma, beta))
        cndf *= 2
        csize //= 2
    p["pyramid"] = pyramid
    p["final"] = nrm(ks[i], (nz, cndf, 4, 4)); i += 1
    p["transX_w"] = nrm(ks[i], (512, nz)); i += 1
    p["transX_b"] = nrm(ks[i], (512,)); i += 1
    p["transA_w"] = nrm(ks[i], (1024, 512 + nz)); i += 1
    p["transA_b"] = nrm(ks[i], (1024,)); i += 1
    p["clas_w"] = nrm(ks[i], (1, 1024)); i += 1
    p["clas_b"] = nrm(ks[i], (1,)); i += 1
    return p


if __name__ == "__main__":
    key = jax.random.PRNGKey(0)
    kx, kz, kp = jax.random.split(key, 3)

    # Small shapes consistent with the module (isize must be a multiple of 16).
    N, nc, isize, ndf, nz = 2, 4, 16, 8, 8
    x = jax.random.normal(kx, (N, nc, isize, isize), jnp.float32)
    z = jax.random.normal(kz, (N, nz), jnp.float32)
    params = init_params(kp, isize, nc, ndf, nz)

    fwd = jax.jit(egbad_discriminator_forward)
    clas, feat = fwd(z, x, params)
    jax.block_until_ready((clas, feat))

    assert clas.shape == (N,), clas.shape
    assert feat.shape == (N, 1024), feat.shape
    assert bool(jnp.all(jnp.isfinite(feat)))
    assert bool(jnp.all((clas >= 0.0) & (clas <= 1.0)))
    print("KERNEL_OK")
</pallas_src>

<mosaic_0001>
module attributes {stable_mosaic.version = 11 : i64} {
  func.func @_conv_lrelu_kernel(%arg0: i32, %arg1: memref<128x64xbf16, #tpu.memory_space<vmem>>, %arg2: memref<64x8xbf16, #tpu.memory_space<vmem>>, %arg3: memref<128x8xbf16, #tpu.memory_space<vmem>>) attributes {dimension_semantics = [#tpu.dimension_semantics<parallel>], iteration_bounds = array<i64: 1>, scalar_prefetch = 0 : i64, scratch_operands = 0 : i64, tpu.core_type = #tpu.core_type<tc>, window_params = [{transform_indices = @transform_0, window_bounds = array<i64: 128, 64>}, {pipeline_mode = #tpu.pipeline_mode<synchronous>, transform_indices = @transform_1, window_bounds = array<i64: 64, 8>}, {transform_indices = @transform_2, window_bounds = array<i64: 128, 8>}]} {
    %c0 = arith.constant 0 : index
    %c0_0 = arith.constant 0 : index
    %0 = vector.load %arg1[%c0, %c0_0] : memref<128x64xbf16, #tpu.memory_space<vmem>>, vector<128x64xbf16>
    %c0_1 = arith.constant 0 : index
    %c0_2 = arith.constant 0 : index
    %1 = vector.load %arg2[%c0_1, %c0_2] : memref<64x8xbf16, #tpu.memory_space<vmem>>, vector<64x8xbf16>
    %cst = arith.constant dense<0.000000e+00> : vector<128x8xf32>
    %2 = tpu.matmul %0, %1, %cst {dimension_numbers = #tpu.dot_dimension_numbers<[1], [0], [0], [1], [0, 0, 1, 1], [], []>} : vector<128x64xbf16>, vector<64x8xbf16>, vector<128x8xf32> -> vector<128x8xf32>
    %cst_3 = arith.constant 0.000000e+00 : f32
    %3 = vector.broadcast %cst_3 : f32 to vector<128x8xf32>
    %4 = arith.cmpf oge, %2, %3 : vector<128x8xf32>
    %cst_4 = arith.constant 2.000000e-01 : f32
    %5 = vector.broadcast %cst_4 : f32 to vector<128x8xf32>
    %6 = arith.mulf %5, %2 : vector<128x8xf32>
    %7 = arith.select %4, %2, %6 : vector<128x8xi1>, vector<128x8xf32>
    %8 = arith.truncf %7 : vector<128x8xf32> to vector<128x8xbf16>
    %c0_5 = arith.constant 0 : index
    %c0_6 = arith.constant 0 : index
    %9 = vector.load %arg3[%c0_5, %c0_6] : memref<128x8xbf16, #tpu.memory_space<vmem>>, vector<128x8xbf16>
    tpu.vector_store %arg3[%c0_5, %c0_6], %8 {strides = array<i32>} : memref<128x8xbf16, #tpu.memory_space<vmem>>, vector<128x8xbf16>,
    return
  }
  func.func @transform_0(%arg0: i32) -> (i32, i32) {
    %c0_i32 = arith.constant 0 : i32
    %c0_i32_0 = arith.constant 0 : i32
    return %arg0, %c0_i32 : i32, i32
  }
  func.func @transform_1(%arg0: i32) -> (i32, i32) {
    %c0_i32 = arith.constant 0 : i32
    %c0_i32_0 = arith.constant 0 : i32
    %c0_i32_1 = arith.constant 0 : i32
    return %c0_i32, %c0_i32_0 : i32, i32
  }
  func.func @transform_2(%arg0: i32) -> (i32, i32) {
    %c0_i32 = arith.constant 0 : i32
    %c0_i32_0 = arith.constant 0 : i32
    return %arg0, %c0_i32 : i32, i32
  }
}

module attributes {stable_mosaic.version = 11 : i64} {
  func.func @_conv_bn_lrelu_kernel(%arg0: i32, %arg1: memref<32x128xbf16, #tpu.memory_space<vmem>>, %arg2: memref<128x16xbf16, #tpu.memory_space<vmem>>, %arg3: memref<1x16xf32, #tpu.memory_space<vmem>>, %arg4: memref<1x16xf32, #tpu.memory_space<vmem>>, %arg5: memref<32x16xbf16, #tpu.memory_space<vmem>>) attributes {dimension_semantics = [#tpu.dimension_semantics<parallel>], iteration_bounds = array<i64: 1>, scalar_prefetch = 0 : i64, scratch_operands = 0 : i64, tpu.core_type = #tpu.core_type<tc>, window_params = [{pipeline_mode = #tpu.pipeline_mode<synchronous>, transform_indices = @transform_0, window_bounds = array<i64: 32, 128>}, {transform_indices = @transform_1, window_bounds = array<i64: 128, 16>}, {transform_indices = @transform_2, window_bounds = array<i64: 1, 16>}, {transform_indices = @transform_3, window_bounds = array<i64: 1, 16>}, {transform_indices = @transform_4, window_bounds = array<i64: 32, 16>}]} {
    %c0 = arith.constant 0 : index
    %c0_0 = arith.constant 0 : index
    %0 = vector.load %arg1[%c0, %c0_0] : memref<32x128xbf16, #tpu.memory_space<vmem>>, vector<32x128xbf16>
    %c0_1 = arith.constant 0 : index
    %c0_2 = arith.constant 0 : index
    %1 = vector.load %arg2[%c0_1, %c0_2] : memref<128x16xbf16, #tpu.memory_space<vmem>>, vector<128x16xbf16>
    %cst = arith.constant dense<0.000000e+00> : vector<32x16xf32>
    %2 = tpu.matmul %0, %1, %cst {dimension_numbers = #tpu.dot_dimension_numbers<[1], [0], [0], [1], [0, 0, 1, 1], [], []>} : vector<32x128xbf16>, vector<128x16xbf16>, vector<32x16xf32> -> vector<32x16xf32>
    %cst_3 = arith.constant dense<0.000000e+00> : vector<16xf32>
    %3 = vector.multi_reduction <add>, %2, %cst_3 [0] : vector<32x16xf32> to vector<16xf32>
    %4 = vector.shape_cast %3 : vector<16xf32> to vector<1x16xf32>
    %cst_4 = arith.constant 3.200000e+01 : f32
    %5 = vector.broadcast %cst_4 : f32 to vector<1x16xf32>
    %6 = arith.divf %4, %5 : vector<1x16xf32>
    %7 = vector.broadcast %6 : vector<1x16xf32> to vector<32x16xf32>
    %8 = arith.subf %2, %7 : vector<32x16xf32>
    %9 = arith.mulf %8, %8 : vector<32x16xf32>
    %cst_5 = arith.constant dense<0.000000e+00> : vector<16xf32>
    %10 = vector.multi_reduction <add>, %9, %cst_5 [0] : vector<32x16xf32> to vector<16xf32>
    %11 = vector.shape_cast %10 : vector<16xf32> to vector<1x16xf32>
    %cst_6 = arith.constant 3.200000e+01 : f32
    %12 = vector.broadcast %cst_6 : f32 to vector<1x16xf32>
    %13 = arith.divf %11, %12 : vector<1x16xf32>
    %cst_7 = arith.constant 9.99999974E-6 : f32
    %14 = vector.broadcast %cst_7 : f32 to vector<1x16xf32>
    %15 = arith.addf %13, %14 : vector<1x16xf32>
    %16 = math.rsqrt %15 : vector<1x16xf32>
    %c0_8 = arith.constant 0 : index
    %c0_9 = arith.constant 0 : index
    %17 = vector.load %arg3[%c0_8, %c0_9] : memref<1x16xf32, #tpu.memory_space<vmem>>, vector<1x16xf32>
    %18 = arith.mulf %17, %16 : vector<1x16xf32>
    %19 = vector.broadcast %18 : vector<1x16xf32> to vector<32x16xf32>
    %20 = arith.mulf %8, %19 : vector<32x16xf32>
    %c0_10 = arith.constant 0 : index
    %c0_11 = arith.constant 0 : index
    %21 = vector.load %arg4[%c0_10, %c0_11] : memref<1x16xf32, #tpu.memory_space<vmem>>, vector<1x16xf32>
    %22 = vector.broadcast %21 : vector<1x16xf32> to vector<32x16xf32>
    %23 = arith.addf %20, %22 : vector<32x16xf32>
    %cst_12 = arith.constant 0.000000e+00 : f32
    %24 = vector.broadcast %cst_12 : f32 to vector<32x16xf32>
    %25 = arith.cmpf oge, %23, %24 : vector<32x16xf32>
    %cst_13 = arith.constant 2.000000e-01 : f32
    %26 = vector.broadcast %cst_13 : f32 to vector<32x16xf32>
    %27 = arith.mulf %26, %23 : vector<32x16xf32>
    %28 = arith.select %25, %23, %27 : vector<32x16xi1>, vector<32x16xf32>
    %29 = arith.truncf %28 : vector<32x16xf32> to vector<32x16xbf16>
    %c0_14 = arith.constant 0 : index
    %c0_15 = arith.constant 0 : index
    %30 = vector.load %arg5[%c0_14, %c0_15] : memref<32x16xbf16, #tpu.memory_space<vmem>>, vector<32x16xbf16>
    tpu.vector_store %arg5[%c0_14, %c0_15], %29 {strides = array<i32>} : memref<32x16xbf16, #tpu.memory_space<vmem>>, vector<32x16xbf16>,
    return
  }
  func.func @transform_0(%arg0: i32) -> (i32, i32) {
    %c0_i32 = arith.constant 0 : i32
    %c0_i32_0 = arith.constant 0 : i32
    %c0_i32_1 = arith.constant 0 : i32
    return %c0_i32, %c0_i32_0 : i32, i32
  }
  func.func @transform_1(%arg0: i32) -> (i32, i32) {
    %c0_i32 = arith.constant 0 : i32
    %c0_i32_0 = arith.constant 0 : i32
    return %c0_i32, %arg0 : i32, i32
  }
  func.func @transform_2(%arg0: i32) -> (i32, i32) {
    %c0_i32 = arith.constant 0 : i32
    %c0_i32_0 = arith.constant 0 : i32
    return %c0_i32, %arg0 : i32, i32
  }
  func.func @transform_3(%arg0: i32) -> (i32, i32) {
    %c0_i32 = arith.constant 0 : i32
    %c0_i32_0 = arith.constant 0 : i32
    return %c0_i32, %arg0 : i32, i32
  }
  func.func @transform_4(%arg0: i32) -> (i32, i32) {
    %c0_i32 = arith.constant 0 : i32
    %c0_i32_0 = arith.constant 0 : i32
    return %c0_i32, %arg0 : i32, i32
  }
}

module attributes {stable_mosaic.version = 11 : i64} {
  func.func @_tail_kernel(%arg0: i32, %arg1: memref<2x256xbf16, #tpu.memory_space<vmem>>, %arg2: memref<2x8xbf16, #tpu.memory_space<vmem>>, %arg3: memref<256x1024xbf16, #tpu.memory_space<vmem>>, %arg4: memref<8x512xbf16, #tpu.memory_space<vmem>>, %arg5: memref<1x512xf32, #tpu.memory_space<vmem>>, %arg6: memref<512x1024xbf16, #tpu.memory_space<vmem>>, %arg7: memref<1x1024xf32, #tpu.memory_space<vmem>>, %arg8: memref<1x1024xf32, #tpu.memory_space<vmem>>, %arg9: memref<1x1xf32, #tpu.memory_space<vmem>>, %arg10: memref<2x1024xf32, #tpu.memory_space<vmem>>, %arg11: memref<2x128xf32, #tpu.memory_space<vmem>>) attributes {dimension_semantics = [#tpu.dimension_semantics<parallel>], iteration_bounds = array<i64: 1>, scalar_prefetch = 0 : i64, scratch_operands = 0 : i64, tpu.core_type = #tpu.core_type<tc>, window_params = [{transform_indices = @transform_0, window_bounds = array<i64: 2, 256>}, {transform_indices = @transform_1, window_bounds = array<i64: 2, 8>}, {pipeline_mode = #tpu.pipeline_mode<synchronous>, transform_indices = @transform_2, window_bounds = array<i64: 256, 1024>}, {pipeline_mode = #tpu.pipeline_mode<synchronous>, transform_indices = @transform_3, window_bounds = array<i64: 8, 512>}, {pipeline_mode = #tpu.pipeline_mode<synchronous>, transform_indices = @transform_4, window_bounds = array<i64: 1, 512>}, {pipeline_mode = #tpu.pipeline_mode<synchronous>, transform_indices = @transform_5, window_bounds = array<i64: 512, 1024>}, {pipeline_mode = #tpu.pipeline_mode<synchronous>, transform_indices = @transform_6, window_bounds = array<i64: 1, 1024>}, {pipeline_mode = #tpu.pipeline_mode<synchronous>, transform_indices = @transform_7, window_bounds = array<i64: 1, 1024>}, {pipeline_mode = #tpu.pipeline_mode<synchronous>, transform_indices = @transform_8, window_bounds = array<i64: 1, 1>}, {transform_indices = @transform_9, window_bounds = array<i64: 2, 1024>}, {transform_indices = @transform_10, window_bounds = array<i64: 2, 128>}]} {
    %c0 = arith.constant 0 : index
    %c0_0 = arith.constant 0 : index
    %0 = vector.load %arg2[%c0, %c0_0] : memref<2x8xbf16, #tpu.memory_space<vmem>>, vector<2x8xbf16>
    %c0_1 = arith.constant 0 : index
    %c0_2 = arith.constant 0 : index
    %1 = vector.load %arg4[%c0_1, %c0_2] : memref<8x512xbf16, #tpu.memory_space<vmem>>, vector<8x512xbf16>
    %cst = arith.constant dense<0.000000e+00> : vector<2x512xf32>
    %2 = tpu.matmul %0, %1, %cst {dimension_numbers = #tpu.dot_dimension_numbers<[1], [0], [0], [1], [0, 0, 1, 1], [], []>} : vector<2x8xbf16>, vector<8x512xbf16>, vector<2x512xf32> -> vector<2x512xf32>
    %c0_3 = arith.constant 0 : index
    %c0_4 = arith.constant 0 : index
    %3 = vector.load %arg5[%c0_3, %c0_4] : memref<1x512xf32, #tpu.memory_space<vmem>>, vector<1x512xf32>
    %4 = vector.broadcast %3 : vector<1x512xf32> to vector<2x512xf32>
    %5 = arith.addf %2, %4 : vector<2x512xf32>
    %cst_5 = arith.constant 0.000000e+00 : f32
    %6 = vector.broadcast %cst_5 : f32 to vector<2x512xf32>
    %7 = arith.cmpf oge, %5, %6 : vector<2x512xf32>
    %cst_6 = arith.constant 2.000000e-01 : f32
    %8 = vector.broadcast %cst_6 : f32 to vector<2x512xf32>
    %9 = arith.mulf %8, %5 : vector<2x512xf32>
    %10 = arith.select %7, %5, %9 : vector<2x512xi1>, vector<2x512xf32>
    %c0_7 = arith.constant 0 : index
    %c0_8 = arith.constant 0 : index
    %11 = vector.load %arg1[%c0_7, %c0_8] : memref<2x256xbf16, #tpu.memory_space<vmem>>, vector<2x256xbf16>
    %c0_9 = arith.constant 0 : index
    %c0_10 = arith.constant 0 : index
    %12 = vector.load %arg3[%c0_9, %c0_10] : memref<256x1024xbf16, #tpu.memory_space<vmem>>, vector<256x1024xbf16>
    %cst_11 = arith.constant dense<0.000000e+00> : vector<2x1024xf32>
    %13 = tpu.matmul %11, %12, %cst_11 {dimension_numbers = #tpu.dot_dimension_numbers<[1], [0], [0], [1], [0, 0, 1, 1], [], []>} : vector<2x256xbf16>, vector<256x1024xbf16>, vector<2x1024xf32> -> vector<2x1024xf32>
    %14 = arith.truncf %10 : vector<2x512xf32> to vector<2x512xbf16>
    %c0_12 = arith.constant 0 : index
    %c0_13 = arith.constant 0 : index
    %15 = vector.load %arg6[%c0_12, %c0_13] : memref<512x1024xbf16, #tpu.memory_space<vmem>>, vector<512x1024xbf16>
    %cst_14 = arith.constant dense<0.000000e+00> : vector<2x1024xf32>
    %16 = tpu.matmul %14, %15, %cst_14 {dimension_numbers = #tpu.dot_dimension_numbers<[1], [0], [0], [1], [0, 0, 1, 1], [], []>} : vector<2x512xbf16>, vector<512x1024xbf16>, vector<2x1024xf32> -> vector<2x1024xf32>
    %17 = arith.addf %13, %16 : vector<2x1024xf32>
    %c0_15 = arith.constant 0 : index
    %c0_16 = arith.constant 0 : index
    %18 = vector.load %arg7[%c0_15, %c0_16] : memref<1x1024xf32, #tpu.memory_space<vmem>>, vector<1x1024xf32>
    %19 = vector.broadcast %18 : vector<1x1024xf32> to vector<2x1024xf32>
    %20 = arith.addf %17, %19 : vector<2x1024xf32>
    %c0_17 = arith.constant 0 : index
    %c0_18 = arith.constant 0 : index
    %21 = vector.load %arg10[%c0_17, %c0_18] : memref<2x1024xf32, #tpu.memory_space<vmem>>, vector<2x1024xf32>
    tpu.vector_store %arg10[%c0_17, %c0_18], %20 {strides = array<i32>} : memref<2x1024xf32, #tpu.memory_space<vmem>>, vector<2x1024xf32>,
    %c0_19 = arith.constant 0 : index
    %c0_20 = arith.constant 0 : index
    %22 = vector.load %arg8[%c0_19, %c0_20] : memref<1x1024xf32, #tpu.memory_space<vmem>>, vector<1x1024xf32>
    %23 = vector.broadcast %22 : vector<1x1024xf32> to vector<2x1024xf32>
    %24 = arith.mulf %20, %23 : vector<2x1024xf32>
    %cst_21 = arith.constant dense<0.000000e+00> : vector<2xf32>
    %25 = vector.multi_reduction <add>, %24, %cst_21 [1] : vector<2x1024xf32> to vector<2xf32>
    %26 = vector.shape_cast %25 : vector<2xf32> to vector<2x1xf32>
    %c0_22 = arith.constant 0 : index
    %c0_23 = arith.constant 0 : index
    %27 = vector.load %arg9[%c0_22, %c0_23] : memref<1x1xf32, #tpu.memory_space<vmem>>, vector<1x1xf32>
    %28 = vector.broadcast %27 : vector<1x1xf32> to vector<2x1xf32>
    %29 = arith.addf %26, %28 : vector<2x1xf32>
    %cst_24 = arith.constant 0.000000e+00 : f32
    %30 = vector.broadcast %cst_24 : f32 to vector<2x1xf32>
    %31 = arith.subf %30, %29 : vector<2x1xf32>
    %32 = math.exp %31 : vector<2x1xf32>
    %cst_25 = arith.constant 1.000000e+00 : f32
    %33 = vector.broadcast %cst_25 : f32 to vector<2x1xf32>
    %34 = arith.addf %33, %32 : vector<2x1xf32>
    %cst_26 = arith.constant 1.000000e+00 : f32
    %35 = vector.broadcast %cst_26 : f32 to vector<2x1xf32>
    %36 = arith.divf %35, %34 : vector<2x1xf32>
    %37 = vector.shape_cast %36 : vector<2x1xf32> to vector<2x1xf32>
    %38 = vector.broadcast %37 : vector<2x1xf32> to vector<2x128xf32>
    %c0_27 = arith.constant 0 : index
    %c0_28 = arith.constant 0 : index
    %39 = vector.load %arg11[%c0_27, %c0_28] : memref<2x128xf32, #tpu.memory_space<vmem>>, vector<2x128xf32>
    tpu.vector_store %arg11[%c0_27, %c0_28], %38 {strides = array<i32>} : memref<2x128xf32, #tpu.memory_space<vmem>>, vector<2x128xf32>,
    return
  }
  func.func @transform_0(%arg0: i32) -> (i32, i32) {
    %c0_i32 = arith.constant 0 : i32
    %c0_i32_0 = arith.constant 0 : i32
    return %arg0, %c0_i32 : i32, i32
  }
  func.func @transform_1(%arg0: i32) -> (i32, i32) {
    %c0_i32 = arith.constant 0 : i32
    %c0_i32_0 = arith.constant 0 : i32
    return %arg0, %c0_i32 : i32, i32
  }
  func.func @transform_2(%arg0: i32) -> (i32, i32) {
    %c0_i32 = arith.constant 0 : i32
    %c0_i32_0 = arith.constant 0 : i32
    %c0_i32_1 = arith.constant 0 : i32
    return %c0_i32, %c0_i32_0 : i32, i32
  }
  func.func @transform_3(%arg0: i32) -> (i32, i32) {
    %c0_i32 = arith.constant 0 : i32
    %c0_i32_0 = arith.constant 0 : i32
    %c0_i32_1 = arith.constant 0 : i32
    return %c0_i32, %c0_i32_0 : i32, i32
  }
  func.func @transform_4(%arg0: i32) -> (i32, i32) {
    %c0_i32 = arith.constant 0 : i32
    %c0_i32_0 = arith.constant 0 : i32
    %c0_i32_1 = arith.constant 0 : i32
    return %c0_i32, %c0_i32_0 : i32, i32
  }
  func.func @transform_5(%arg0: i32) -> (i32, i32) {
    %c0_i32 = arith.constant 0 : i32
    %c0_i32_0 = arith.constant 0 : i32
    %c0_i32_1 = arith.constant 0 : i32
    return %c0_i32, %c0_i32_0 : i32, i32
  }
  func.func @transform_6(%arg0: i32) -> (i32, i32) {
    %c0_i32 = arith.constant 0 : i32
    %c0_i32_0 = arith.constant 0 : i32
    %c0_i32_1 = arith.constant 0 : i32
    return %c0_i32, %c0_i32_0 : i32, i32
  }
  func.func @transform_7(%arg0: i32) -> (i32, i32) {
    %c0_i32 = arith.constant 0 : i32
    %c0_i32_0 = arith.constant 0 : i32
    %c0_i32_1 = arith.constant 0 : i32
    return %c0_i32, %c0_i32_0 : i32, i32
  }
  func.func @transform_8(%arg0: i32) -> (i32, i32) {
    %c0_i32 = arith.constant 0 : i32
    %c0_i32_0 = arith.constant 0 : i32
    %c0_i32_1 = arith.constant 0 : i32
    return %c0_i32, %c0_i32_0 : i32, i32
  }
  func.func @transform_9(%arg0: i32) -> (i32, i32) {
    %c0_i32 = arith.constant 0 : i32
    %c0_i32_0 = arith.constant 0 : i32
    return %arg0, %c0_i32 : i32, i32
  }
  func.func @transform_10(%arg0: i32) -> (i32, i32) {
    %c0_i32 = arith.constant 0 : i32
    %c0_i32_0 = arith.constant 0 : i32
    return %arg0, %c0_i32 : i32, i32
  }
}

</mosaic_0001>

<bundles_post_ra>
// kernel: egbad_discriminator_forward.3
= control target key start
LH: loop header
LB: loop body
LE: loop exit
PB: predicated region body
PF: predicated region fallthrough
CT: control target
= control target key end

     0   :  { %vm100_vm0 = vcmask 523264   ;;  %vm334_vm3 = vcmask 60416   ;;  %s587_s1 = inlined_call_operand.vmem [shape: bf16[64,8], index: 1, kind: input, shape index: {}]   ;;  %s588_s0 = inlined_call_operand.vmem [shape: bf16[128,64], index: 0, kind: input, shape index: {}]   ;;  %s589_s2 = inlined_call_operand.vmem [shape: bf16[128,8], index: 2, kind: output, shape index: {}]  }
   0x1   :  { %v451_v0 = vld [vmem:[%s587_s1] sm:$0xff]   ;;  %v452_v1 = vld [vmem:[%s587_s1 + $0x8] sm:$0xff]   ;;  %v453_v2 = vld [vmem:[%s587_s1 + $0x10] sm:$0xff]  }
   0x2   :  { %419 = vmatprep.subr.bf16.mxu0 %v451_v0  ;;  %443 = vmatprep.subr.bf16.mxu1 %v451_v0  ;;  %v455_v3 = vld [vmem:[%s588_s0] sm:$0xff]   ;;  %v454_v5 = vld [vmem:[%s587_s1 + $0x18] sm:$0xff]   ;;  %v457_v6 = vld [vmem:[%s588_s0 + $0x8] sm:$0xff]  }
   0x3   :  { %420 = vmatpush3.bf16.msra.mxu0 %v451_v0  ;;  %447 = vmatpush3.bf16.msra.mxu1 %v451_v0  ;;  %v456_v4 = vld [vmem:[%s588_s0 + $0x20] sm:$0xff]   ;;  %v458_v7 = vld [vmem:[%s588_s0 + $0x28] sm:$0xff]   ;;  %v459_v8 = vld [vmem:[%s588_s0 + $0x10] sm:$0xff]  }
   0x4   :  { %421 = vmatprep.subr.bf16.mxu0 %v452_v1  ;;  %444 = vmatprep.subr.bf16.mxu1 %v452_v1  ;;  %v460_v9 = vld [vmem:[%s588_s0 + $0x30] sm:$0xff]   ;;  %v461_v10 = vld [vmem:[%s588_s0 + $0x18] sm:$0xff]  }
   0x5   :  { %427 = vmatprep.mubr.msk.bf16.mxu0 %vm100_vm0, %v455_v3  ;;  %435 = vmatprep.mubr.msk.bf16.mxu1 %vm100_vm0, %v456_v4  ;;  %v462_v11 = vld [vmem:[%s588_s0 + $0x38] sm:$0xff]  }
   0x7   :  { %422 = vmatpush3.bf16.msra.mxu0 %v452_v1  ;;  %448 = vmatpush3.bf16.msra.mxu1 %v452_v1 }
   0x8   :  { %423 = vmatprep.subr.bf16.mxu0 %v453_v2  ;;  %445 = vmatprep.subr.bf16.mxu1 %v453_v2 }
   0xb   :  { %424 = vmatpush3.bf16.msra.mxu0 %v453_v2  ;;  %449 = vmatpush3.bf16.msra.mxu1 %v453_v2 }
   0xc   :  { %425 = vmatprep.subr.bf16.mxu0 %v454_v5  ;;  %446 = vmatprep.subr.bf16.mxu1 %v454_v5 }
   0xf   :  { %426 = vmatpush3.bf16.msra.mxu0 %v454_v5  ;;  %450 = vmatpush3.bf16.msra.mxu1 %v454_v5 }
  0x12   :  { %428 = vmatmul.mubr.msk.bf16.vlgmr.msra.gmra.mrb[0].mxu0 %vm100_vm0, %v457_v6  ;;  %436 = vmatmul.mubr.msk.bf16.vlgmr.msra.gmra.mrb[0].mxu1 %vm100_vm0, %v458_v7 }
  0x13   :  { %431 = vmatprep.mubr.msk.bf16.mxu0 %vm100_vm0, %v459_v8  ;;  %439 = vmatprep.mubr.msk.bf16.mxu1 %vm100_vm0, %v460_v9 }
  0x1a   :  { %432 = vmatmul.mubr.msk.bf16.gmra.mrb[4].mxu0 %vm100_vm0, %v461_v10  ;;  %440 = vmatmul.mubr.msk.bf16.gmra.mrb[4].mxu1 %vm100_vm0, %v462_v11 }
  0xe5   :  { %v429_v12 = vpop.f32.mrb[0].mxu0  ;;  %v437_v13 = vpop.f32.mrb[0].mxu1 }
  0xe6   :  { %vm224_vm1 = vcmp.ge.f32.partialorder %v429_v12, 0.0  ;;  %v240_v14 = vmul.f32 0.2, %v429_v12  ;;  %vm232_vm2 = vcmp.ge.f32.partialorder %v437_v13, 0.0  ;;  %v248_v15 = vmul.f32 0.2, %v437_v13 }
  0xe7   :  { %v159_v16 = vpop.f32.mrb[1].mxu0  ;;  %v191_v17 = vpop.f32.mrb[1].mxu1 }
  0xe8   :  { %v256_v18 = vsel %vm224_vm1, %v429_v12, %v240_v14  ;;  %v264_v19 = vsel %vm232_vm2, %v437_v13, %v248_v15  ;;  %vm222_vm4 = vcmp.ge.f32.partialorder %v159_v16, 0.0  ;;  %v238_v20 = vmul.f32 0.2, %v159_v16  ;;  %v430_v21 = vpop.f32.mrb[2].mxu0  ;;  %v438_v22 = vpop.f32.mrb[2].mxu1 }
  0xe9   :  { %v393_v23 = vpack.c.bf16 %v256_v18, %v256_v18  ;;  %v401_v24 = vpack.c.bf16 %v264_v19, %v264_v19  ;;  %vm230_vm5 = vcmp.ge.f32.partialorder %v191_v17, 0.0  ;;  %v246_v25 = vmul.f32 0.2, %v191_v17  ;;  %v162_v26 = vpop.f32.mrb[3].mxu0  ;;  %v194_v27 = vpop.f32.mrb[3].mxu1 }
  0xea   :  { %v254_v28 = vsel %vm222_vm4, %v159_v16, %v238_v20  ;;  %vm225_vm6 = vcmp.ge.f32.partialorder %v430_v21, 0.0  ;;  %v241_v29 = vmul.f32 0.2, %v430_v21  ;;  %vm233_vm7 = vcmp.ge.f32.partialorder %v438_v22, 0.0 }
  0xeb   :  { %337 = vst.msk [vmem:[%s589_s2 + $0x8] sm:$0xf] %vm334_vm3, %v393_v23  ;;  %345 = vst.msk [vmem:[%s589_s2 + $0x28] sm:$0xf] %vm334_vm3, %v401_v24  ;;  %v391_v30 = vpack.c.bf16 %v254_v28, %v254_v28  ;;  %v262_v31 = vsel %vm230_vm5, %v191_v17, %v246_v25  ;;  %v249_v32 = vmul.f32 0.2, %v438_v22 }
  0xec   :  { %vm223_vm8 = vcmp.ge.f32.partialorder %v162_v26, 0.0  ;;  %v399_v33 = vpack.c.bf16 %v262_v31, %v262_v31  ;;  %v257_v34 = vsel %vm225_vm6, %v430_v21, %v241_v29  ;;  %v239_v35 = vmul.f32 0.2, %v162_v26 }
  0xed   :  { %vm231_vm9 = vcmp.ge.f32.partialorder %v194_v27, 0.0  ;;  %335 = vst.msk [vmem:[%s589_s2] sm:$0xf] %vm334_vm3, %v391_v30  ;;  %v394_v36 = vpack.c.bf16 %v257_v34, %v257_v34  ;;  %v265_v37 = vsel %vm233_vm7, %v438_v22, %v249_v32  ;;  %v247_v38 = vmul.f32 0.2, %v194_v27  ;;  %v433_v39 = vpop.f32.mrb[4].mxu0 }
  0xee   :  { %v441_v40 = vpop.f32.mrb[4].mxu1  ;;  %343 = vst.msk [vmem:[%s589_s2 + $0x20] sm:$0xf] %vm334_vm3, %v399_v33  ;;  %v402_v41 = vpack.c.bf16 %v265_v37, %v265_v37  ;;  %v255_v42 = vsel %vm223_vm8, %v162_v26, %v239_v35  ;;  %vm228_vm10 = vcmp.ge.f32.partialorder %v433_v39, 0.0  ;;  %v244_v43 = vmul.f32 0.2, %v433_v39 }
  0xef   :  { %v175_v44 = vpop.f32.mrb[5].mxu0  ;;  %v207_v45 = vpop.f32.mrb[5].mxu1  ;;  %338 = vst.msk [vmem:[%s589_s2 + $0xc] sm:$0xf] %vm334_vm3, %v394_v36  ;;  %v392_v46 = vpack.c.bf16 %v255_v42, %v255_v42  ;;  %v263_v47 = vsel %vm231_vm9, %v194_v27, %v247_v38  ;;  %vm236_vm11 = vcmp.ge.f32.partialorder %v441_v40, 0.0 }
  0xf0   :  { %v252_v48 = vmul.f32 0.2, %v441_v40  ;;  %v434_v49 = vpop.f32.mrb[6].mxu0  ;;  %v442_v50 = vpop.f32.mrb[6].mxu1  ;;  %346 = vst.msk [vmem:[%s589_s2 + $0x2c] sm:$0xf] %vm334_vm3, %v402_v41  ;;  %v400_v51 = vpack.c.bf16 %v263_v47, %v263_v47  ;;  %v260_v52 = vsel %vm228_vm10, %v433_v39, %v244_v43 }
  0xf1   :  { %vm226_vm12 = vcmp.ge.f32.partialorder %v175_v44, 0.0  ;;  %v242_v53 = vmul.f32 0.2, %v175_v44  ;;  %v178_v54 = vpop.f32.mrb[7].mxu0  ;;  %v210_v55 = vpop.f32.mrb[7].mxu1  ;;  %v397_v56 = vpack.c.bf16 %v260_v52, %v260_v52  ;;  %vm234_vm13 = vcmp.ge.f32.partialorder %v207_v45, 0.0 }
  0xf2   :  { %336 = vst.msk [vmem:[%s589_s2 + $0x4] sm:$0xf] %vm334_vm3, %v392_v46  ;;  %v268_v57 = vsel %vm236_vm11, %v441_v40, %v252_v48  ;;  %v250_v58 = vmul.f32 0.2, %v207_v45  ;;  %344 = vst.msk [vmem:[%s589_s2 + $0x24] sm:$0xf] %vm334_vm3, %v400_v51 }
  0xf3   :  { %v405_v59 = vpack.c.bf16 %v268_v57, %v268_v57  ;;  %v258_v60 = vsel %vm226_vm12, %v175_v44, %v242_v53  ;;  %vm229_vm14 = vcmp.ge.f32.partialorder %v434_v49, 0.0  ;;  %v245_v61 = vmul.f32 0.2, %v434_v49  ;;  %341 = vst.msk [vmem:[%s589_s2 + $0x18] sm:$0xf] %vm334_vm3, %v397_v56 }
  0xf4   :  { %v395_v62 = vpack.c.bf16 %v258_v60, %v258_v60  ;;  %v266_v63 = vsel %vm234_vm13, %v207_v45, %v250_v58  ;;  %vm237_vm15 = vcmp.ge.f32.partialorder %v442_v50, 0.0  ;;  %v253_v0 = vmul.f32 0.2, %v442_v50 }
  0xf5   :  { %349 = vst.msk [vmem:[%s589_s2 + $0x38] sm:$0xf] %vm334_vm3, %v405_v59  ;;  %v403_v1 = vpack.c.bf16 %v266_v63, %v266_v63  ;;  %v261_v2 = vsel %vm229_vm14, %v434_v49, %v245_v61  ;;  %vm227_vm0 = vcmp.ge.f32.partialorder %v178_v54, 0.0  ;;  %v243_v3 = vmul.f32 0.2, %v178_v54 }
  0xf6   :  { %339 = vst.msk [vmem:[%s589_s2 + $0x10] sm:$0xf] %vm334_vm3, %v395_v62  ;;  %v398_v4 = vpack.c.bf16 %v261_v2, %v261_v2  ;;  %v269_v5 = vsel %vm237_vm15, %v442_v50, %v253_v0  ;;  %vm235_vm1 = vcmp.ge.f32.partialorder %v210_v55, 0.0  ;;  %v251_v6 = vmul.f32 0.2, %v210_v55 }
  0xf7   :  { %347 = vst.msk [vmem:[%s589_s2 + $0x30] sm:$0xf] %vm334_vm3, %v403_v1  ;;  %v406_v7 = vpack.c.bf16 %v269_v5, %v269_v5  ;;  %v259_v8 = vsel %vm227_vm0, %v178_v54, %v243_v3 }
  0xf8   :  { %342 = vst.msk [vmem:[%s589_s2 + $0x1c] sm:$0xf] %vm334_vm3, %v398_v4  ;;  %v396_v9 = vpack.c.bf16 %v259_v8, %v259_v8  ;;  %v267_v10 = vsel %vm235_vm1, %v210_v55, %v251_v6 }
  0xf9   :  { %350 = vst.msk [vmem:[%s589_s2 + $0x3c] sm:$0xf] %vm334_vm3, %v406_v7  ;;  %v404_v11 = vpack.c.bf16 %v267_v10, %v267_v10 }
  0xfa   :  { %340 = vst.msk [vmem:[%s589_s2 + $0x14] sm:$0xf] %vm334_vm3, %v396_v9 }
  0xfb   :  { %348 = vst.msk [vmem:[%s589_s2 + $0x34] sm:$0xf] %vm334_vm3, %v404_v11 }

// kernel: egbad_discriminator_forward.4
= control target key start
LH: loop header
LB: loop body
LE: loop exit
PB: predicated region body
PF: predicated region fallthrough
CT: control target
= control target key end

     0   :  { %vm147_vm0 = vcmask 130048   ;;  %v190_v51 = vlaneseq  ;;  %vm238_vm5 = vcmask 125952   ;;  %s389_s1 = inlined_call_operand.vmem [shape: bf16[128,16], index: 1, kind: input, shape index: {}]   ;;  %s390_s0 = inlined_call_operand.vmem [shape: bf16[32,128], index: 0, kind: input, shape index: {}]   ;;  %s391_s2 = inlined_call_operand.vmem [shape: f32[1,16], index: 2, kind: input, shape index: {}]   ;;  %s392_s3 = inlined_call_operand.vmem [shape: f32[1,16], index: 3, kind: input, shape index: {}]   ;;  %s393_s4 = inlined_call_operand.vmem [shape: bf16[32,16], index: 4, kind: output, shape index: {}]  }
   0x1   :  { %v296_v0 = vld [vmem:[%s389_s1] sm:$0xff]   ;;  %v297_v1 = vld [vmem:[%s389_s1 + $0x8] sm:$0xff]   ;;  %v298_v2 = vld [vmem:[%s389_s1 + $0x10] sm:$0xff]  }
   0x2   :  { %276 = vmatprep.subr.bf16.mxu0 %v296_v0  ;;  %v299_v3 = vld [vmem:[%s389_s1 + $0x18] sm:$0xff]   ;;  %v304_v4 = vld [vmem:[%s390_s0] sm:$0xff]   ;;  %v301_v6 = vld [vmem:[%s389_s1 + $0x28] sm:$0xff]   ;;  %v191_v52 = vshrl.u32 %v190_v51, 7 }
   0x3   :  { %277 = vmatpush3.bf16.msra.mxu0 %v296_v0  ;;  %292 = vmatprep.mubr.bf16.mxu0 %v304_v4  ;;  %v300_v5 = vld [vmem:[%s389_s1 + $0x20] sm:$0xff]   ;;  %v302_v7 = vld [vmem:[%s389_s1 + $0x30] sm:$0xff]   ;;  %v303_v8 = vld [vmem:[%s389_s1 + $0x38] sm:$0xff]  }
   0x4   :  { %278 = vmatprep.subr.bf16.mxu0 %v297_v1  ;;  %v305_v9 = vld [vmem:[%s390_s0 + $0x8] sm:$0xff]   ;;  %v187_v53 = vld [vmem:[%s391_s2] sm:$0x1]  ;;  %v192_v54 = vsub.s32 0, %v191_v52 }
   0x5   :  { %v257_v58 = vld [vmem:[%s392_s3] ss:$0 sm:$0xff] }
   0x7   :  { %279 = vmatpush3.bf16.msra.mxu0 %v297_v1 }
   0x8   :  { %280 = vmatprep.subr.bf16.mxu0 %v298_v2 }
   0xb   :  { %281 = vmatpush3.bf16.msra.mxu0 %v298_v2 }
   0xc   :  { %282 = vmatprep.subr.bf16.mxu0 %v299_v3 }
   0xf   :  { %283 = vmatpush3.bf16.msra.mxu0 %v299_v3 }
  0x10   :  { %284 = vmatprep.subr.bf16.mxu0 %v300_v5 }
  0x13   :  { %285 = vmatpush3.bf16.msra.mxu0 %v300_v5 }
  0x14   :  { %286 = vmatprep.subr.bf16.mxu0 %v301_v6 }
  0x17   :  { %287 = vmatpush3.bf16.msra.mxu0 %v301_v6 }
  0x18   :  { %288 = vmatprep.subr.bf16.mxu0 %v302_v7 }
  0x1b   :  { %289 = vmatpush3.bf16.msra.mxu0 %v302_v7 }
  0x1c   :  { %290 = vmatprep.subr.bf16.mxu0 %v303_v8 }
  0x1f   :  { %291 = vmatpush3.bf16.msra.mxu0 %v303_v8 }
  0x22   :  { %293 = vmatmul.mubr.bf16.vlgmr.msra.gmra.mrb[0].mxu0 %v305_v9 }
  0xf5   :  { %v294_v10 = vpop.f32.mrb[0].mxu0 }
  0xf6   :  { %v132_v11 = vpop.f32.mrb[1].mxu0  ;;  %v151_v17 = vsel %vm147_vm0, %v294_v10, 0.0 }
  0xf7   :  { %v295_v12 = vpop.f32.mrb[2].mxu0  ;;  %v148_v14 = vsel %vm147_vm0, %v132_v11, 0.0 }
  0xf8   :  { %v135_v13 = vpop.f32.mrb[3].mxu0  ;;  %v153_v19 = vsel %vm147_vm0, %v295_v12, 0.0 }
  0xf9   :  { %v149_v15 = vsel %vm147_vm0, %v135_v13, 0.0 }
  0xfa   :  { %v150_v16 = vadd.f32 %v149_v15, %v148_v14 }
  0xfc   :  { %v152_v18 = vadd.f32 %v151_v17, %v150_v16 }
  0xfe   :  { %v154_v20 = vadd.f32 %v153_v19, %v152_v18 }
 0x100   :  { %v155_v21 = vrot.slane %v154_v20, 4 }
 0x102   :  { %v156_v22 = vadd.f32 %v155_v21, %v154_v20 }
 0x104   :  { %v157_v23 = vrot.slane %v156_v22, 2 }
 0x106   :  { %v158_v24 = vadd.f32 %v157_v23, %v156_v22 }
 0x108   :  { %v159_v25 = vrot.slane %v158_v24, 1 }
 0x10a   :  { %v160_v26 = vadd.f32 %v159_v25, %v158_v24 }
 0x10c   :  { %v162_v27 = vmul.f32 0.03125, %v160_v26 }
 0x10e   :  { %v163_v28 = vsub.f32 %v132_v11, %v162_v27  ;;  %v164_v29 = vsub.f32 %v135_v13, %v162_v27  ;;  %v165_v30 = vsub.f32 %v294_v10, %v162_v27  ;;  %v166_v31 = vsub.f32 %v295_v12, %v162_v27 }
 0x110   :  { %v167_v32 = vmul.f32 %v163_v28, %v163_v28  ;;  %v168_v33 = vmul.f32 %v164_v29, %v164_v29  ;;  %v169_v34 = vmul.f32 %v165_v30, %v165_v30  ;;  %v170_v35 = vmul.f32 %v166_v31, %v166_v31 }
 0x112   :  { %v171_v36 = vsel %vm147_vm0, %v167_v32, 0.0  ;;  %v172_v37 = vsel %vm147_vm0, %v168_v33, 0.0  ;;  %v174_v39 = vsel %vm147_vm0, %v169_v34, 0.0  ;;  %v176_v41 = vsel %vm147_vm0, %v170_v35, 0.0 }
 0x113   :  { %v173_v38 = vadd.f32 %v172_v37, %v171_v36 }
 0x115   :  { %v175_v40 = vadd.f32 %v174_v39, %v173_v38 }
 0x117   :  { %v177_v42 = vadd.f32 %v176_v41, %v175_v40 }
 0x119   :  { %v178_v43 = vrot.slane %v177_v42, 4 }
 0x11b   :  { %v179_v44 = vadd.f32 %v178_v43, %v177_v42 }
 0x11d   :  { %v180_v45 = vrot.slane %v179_v44, 2 }
 0x11f   :  { %v181_v46 = vadd.f32 %v180_v45, %v179_v44 }
 0x121   :  { %v182_v47 = vrot.slane %v181_v46, 1 }
 0x123   :  { %v183_v48 = vadd.f32 %v182_v47, %v181_v46 }
 0x125   :  { %v184_v49 = vmul.f32 0.03125, %v183_v48 }
 0x127   :  { %v185_v50 = vadd.f32 1e-05, %v184_v49 }
 0x129   :  { %306 = vrsqrt.f32 %v185_v50 }
 0x133   :  { %v307_v55 = vpop.eup %306 }
 0x134   :  { %v188_v56 = vmul.f32 %v307_v55, %v187_v53 }
 0x136   :  { %v193_v57 = vrot.slane %v188_v56, %v192_v54 }
 0x138   :  { %v195_v59 = vmul.f32 %v193_v57, %v163_v28  ;;  %v196_v60 = vmul.f32 %v193_v57, %v164_v29  ;;  %v197_v61 = vmul.f32 %v193_v57, %v165_v30  ;;  %v198_v62 = vmul.f32 %v193_v57, %v166_v31 }
 0x13a   :  { %v206_v63 = vadd.f32 %v257_v58, %v195_v59  ;;  %v207_v0 = vadd.f32 %v257_v58, %v196_v60  ;;  %v208_v1 = vadd.f32 %v257_v58, %v197_v61  ;;  %v209_v2 = vadd.f32 %v257_v58, %v198_v62 }
 0x13c   :  { %vm210_vm1 = vcmp.ge.f32.partialorder %v206_v63, 0.0  ;;  %vm211_vm2 = vcmp.ge.f32.partialorder %v207_v0, 0.0  ;;  %vm212_vm3 = vcmp.ge.f32.partialorder %v208_v1, 0.0  ;;  %vm213_vm4 = vcmp.ge.f32.partialorder %v209_v2, 0.0 }
 0x13d   :  { %v214_v3 = vmul.f32 0.2, %v206_v63  ;;  %v215_v4 = vmul.f32 0.2, %v207_v0  ;;  %v216_v5 = vmul.f32 0.2, %v208_v1 }
 0x13e   :  { %v217_v6 = vmul.f32 0.2, %v209_v2 }
 0x13f   :  { %v218_v7 = vsel %vm210_vm1, %v206_v63, %v214_v3  ;;  %v219_v8 = vsel %vm211_vm2, %v207_v0, %v215_v4  ;;  %v220_v9 = vsel %vm212_vm3, %v208_v1, %v216_v5 }
 0x140   :  { %v221_v10 = vsel %vm213_vm4, %v209_v2, %v217_v6  ;;  %v262_v11 = vpack.c.bf16 %v218_v7, %v218_v7  ;;  %v263_v12 = vpack.c.bf16 %v219_v8, %v219_v8  ;;  %v264_v13 = vpack.c.bf16 %v220_v9, %v220_v9 }
 0x141   :  { %v265_v14 = vpack.c.bf16 %v221_v10, %v221_v10 }
 0x142   :  { %239 = vst.msk [vmem:[%s393_s4] sm:$0xf] %vm238_vm5, %v262_v11  ;;  %240 = vst.msk [vmem:[%s393_s4 + $0x4] sm:$0xf] %vm238_vm5, %v263_v12 }
 0x143   :  { %241 = vst.msk [vmem:[%s393_s4 + $0x8] sm:$0xf] %vm238_vm5, %v264_v13  ;;  %242 = vst.msk [vmem:[%s393_s4 + $0xc] sm:$0xf] %vm238_vm5, %v265_v14 }

// kernel: egbad_discriminator_forward.5
= control target key start
LH: loop header
LB: loop body
LE: loop exit
PB: predicated region body
PF: predicated region fallthrough
CT: control target
= control target key end

     0   :  { %s5028_s0 = inlined_call_operand.vmem [shape: bf16[2,256], index: 0, kind: input, shape index: {}]   ;;  %s5029_s1 = inlined_call_operand.vmem [shape: bf16[2,8], index: 1, kind: input, shape index: {}]   ;;  %s5030_s2 = inlined_call_operand.vmem [shape: bf16[256,1024], index: 2, kind: input, shape index: {}]   ;;  %s5031_s3 = inlined_call_operand.vmem [shape: bf16[8,512], index: 3, kind: input, shape index: {}]   ;;  %s5032_s4 = inlined_call_operand.vmem [shape: f32[1,512], index: 4, kind: input, shape index: {}]   ;;  %s5033_s5 = inlined_call_operand.vmem [shape: bf16[512,1024], index: 5, kind: input, shape index: {}]   ;;  %s5034_s6 = inlined_call_operand.vmem [shape: f32[1,1024], index: 6, kind: input, shape index: {}]   ;;  %s5035_s7 = inlined_call_operand.vmem [shape: f32[1,1024], index: 7, kind: input, shape index: {}]   ;;  %s5036_s8 = inlined_call_operand.<no memory space> [shape: f32[1,1], index: 8, kind: input, shape index: {}]   ;;  %s5037_s9 = inlined_call_operand.hbm [shape: f32[2,1024], index: 9, kind: output, shape index: {0}]   ;;  %s5038_s10 = inlined_call_operand.vmem [shape: f32[2,128], index: 10, kind: output, shape index: {1}]  }
   0x1   :  { %v16_v0 = vstv %s5036_s8 }
   0x2   :  { %17 = vst [vmem:[#allocation2] sm:$0x1] %v16_v0 }
   0x3   :  { %v39_v1 = vld [vmem:[%s5031_s3] sm:$0xff]  ;;  %vm77_vm0 = vcmask 1043456   ;;  %v40_v2 = vld [vmem:[%s5031_s3 + $0x8] sm:$0xff]  ;;  %v3643_v7 = vmov 0   ;;  %vm73_vm1 = vcmask 64512  }
   0x4   :  { %v3213_v3 = vcombine.high %v39_v1, %v39_v1  ;;  %v3215_v4 = vcombine.high %v40_v2, %v40_v2  ;;  %v3212_v5 = vcombine.low %v39_v1, %v39_v1  ;;  %v3214_v6 = vcombine.low %v40_v2, %v40_v2  ;;  %122 = vmatprep.mubr.bf16.mxu0 %v3643_v7  ;;  %v317_v8 = vld [vmem:[%s5033_s5] sm:$0xff] }
   0x5   :  { %v321_v9 = vld [vmem:[%s5033_s5 + $0x20] sm:$0xff]  ;;  %163 = vmatprep.mubr.bf16.mxu1 %v3643_v7  ;;  %3610 = vset.pattern.permute.xlu0 %v3643_v7 }
   0x6   :  { %v445_v10 = vld [vmem:[%s5033_s5 + $0x400] sm:$0xff]  ;;  %v3221_v11 = vcombine.high %v317_v8, %v321_v9  ;;  %3216 = vmatprep.subr.msk.bf16.mxu0 %vm77_vm0, %v3213_v3  ;;  %3218 = vmatprep.subr.msk.bf16.mxu1 %vm77_vm0, %v3215_v4  ;;  %v79_v15 = vsel %vm77_vm0, %v3212_v5, 0  ;;  %v85_v16 = vsel %vm77_vm0, %v3214_v6, 0  ;;  %v3220_v21 = vcombine.low %v317_v8, %v321_v9 }
   0x7   :  { %v449_v12 = vld [vmem:[%s5033_s5 + $0x420] sm:$0xff]  ;;  %91 = vmatpush1.bf16.msra.mxu0 %v79_v15  ;;  %132 = vmatpush1.bf16.msra.mxu1 %v85_v16 }
   0x8   :  { %v325_v13 = vld [vmem:[%s5033_s5 + $0x40] sm:$0xff]  ;;  %v3349_v17 = vcombine.high %v445_v10, %v449_v12  ;;  %v3348_v22 = vcombine.low %v445_v10, %v449_v12  ;;  %1853 = vmatprep.subr.bf16.mxu0 %v3221_v11 }
   0x9   :  { %v329_v14 = vld [vmem:[%s5033_s5 + $0x60] sm:$0xff] }
   0xa   :  { %v453_v18 = vld [vmem:[%s5033_s5 + $0x440] sm:$0xff]  ;;  %1894 = vmatprep.subr.bf16.mxu1 %v3349_v17  ;;  %v3229_v23 = vcombine.high %v325_v13, %v329_v14  ;;  %v3228_v29 = vcombine.low %v325_v13, %v329_v14 }
   0xb   :  { %v457_v19 = vld [vmem:[%s5033_s5 + $0x460] sm:$0xff] }
   0xc   :  { %v38_v20 = vld [vmem:[%s5029_s1] sm:$0x1]  ;;  %v3357_v24 = vcombine.high %v453_v18, %v457_v19  ;;  %v3356_v30 = vcombine.low %v453_v18, %v457_v19 }
   0xd   :  { %v333_v25 = vld [vmem:[%s5033_s5 + $0x80] sm:$0xff]  ;;  %3217 = vmatmul.mubr.msk.bf16.vlgmr.msra.gmra.mrb[0].mxu0 %vm73_vm1, %v38_v20  ;;  %3219 = vmatmul.mubr.msk.bf16.vlgmr.msra.gmra.mrb[0].mxu1 %vm73_vm1, %v38_v20 }
   0xe   :  { %v337_v26 = vld [vmem:[%s5033_s5 + $0xa0] sm:$0xff]  ;;  %1854 = vmatpush1.bf16.msra.mxu0 %v3220_v21  ;;  %1895 = vmatpush1.bf16.msra.mxu1 %v3348_v22 }
   0xf   :  { %v461_v27 = vld [vmem:[%s5033_s5 + $0x480] sm:$0xff]  ;;  %1855 = vmatprep.subr.bf16.mxu0 %v3229_v23  ;;  %1896 = vmatprep.subr.bf16.mxu1 %v3357_v24  ;;  %v3237_v31 = vcombine.high %v333_v25, %v337_v26  ;;  %v3236_v37 = vcombine.low %v333_v25, %v337_v26 }
  0x10   :  { %v465_v28 = vld [vmem:[%s5033_s5 + $0x4a0] sm:$0xff] }
  0x11   :  { %v3365_v32 = vcombine.high %v461_v27, %v465_v28  ;;  %v341_v33 = vld [vmem:[%s5033_s5 + $0xc0] sm:$0xff]  ;;  %v3364_v38 = vcombine.low %v461_v27, %v465_v28 }
  0x12   :  { %v345_v34 = vld [vmem:[%s5033_s5 + $0xe0] sm:$0xff]  ;;  %1856 = vmatpush1.bf16.msra.mxu0 %v3228_v29  ;;  %1897 = vmatpush1.bf16.msra.mxu1 %v3356_v30 }
  0x13   :  { %v469_v35 = vld [vmem:[%s5033_s5 + $0x4c0] sm:$0xff]  ;;  %1857 = vmatprep.subr.bf16.mxu0 %v3237_v31  ;;  %1898 = vmatprep.subr.bf16.mxu1 %v3365_v32  ;;  %v3245_v39 = vcombine.high %v341_v33, %v345_v34  ;;  %v3244_v45 = vcombine.low %v341_v33, %v345_v34 }
  0x14   :  { %v473_v36 = vld [vmem:[%s5033_s5 + $0x4e0] sm:$0xff] }
  0x15   :  { %v3373_v40 = vcombine.high %v469_v35, %v473_v36  ;;  %v349_v41 = vld [vmem:[%s5033_s5 + $0x100] sm:$0xff]  ;;  %v3372_v46 = vcombine.low %v469_v35, %v473_v36 }
  0x16   :  { %v353_v42 = vld [vmem:[%s5033_s5 + $0x120] sm:$0xff]  ;;  %1858 = vmatpush1.bf16.msra.mxu0 %v3236_v37  ;;  %1899 = vmatpush1.bf16.msra.mxu1 %v3364_v38 }
  0x17   :  { %v477_v43 = vld [vmem:[%s5033_s5 + $0x500] sm:$0xff]  ;;  %1859 = vmatprep.subr.bf16.mxu0 %v3245_v39  ;;  %1900 = vmatprep.subr.bf16.mxu1 %v3373_v40  ;;  %v3253_v47 = vcombine.high %v349_v41, %v353_v42  ;;  %v3252_v53 = vcombine.low %v349_v41, %v353_v42 }
  0x18   :  { %v481_v44 = vld [vmem:[%s5033_s5 + $0x520] sm:$0xff] }
  0x19   :  { %v3381_v48 = vcombine.high %v477_v43, %v481_v44  ;;  %v357_v49 = vld [vmem:[%s5033_s5 + $0x140] sm:$0xff]  ;;  %v3380_v54 = vcombine.low %v477_v43, %v481_v44 }
  0x1a   :  { %v361_v50 = vld [vmem:[%s5033_s5 + $0x160] sm:$0xff]  ;;  %1860 = vmatpush1.bf16.msra.mxu0 %v3244_v45  ;;  %1901 = vmatpush1.bf16.msra.mxu1 %v3372_v46 }
  0x1b   :  { %v485_v51 = vld [vmem:[%s5033_s5 + $0x540] sm:$0xff] }
  0x1c   :  { %v489_v52 = vld [vmem:[%s5033_s5 + $0x560] sm:$0xff] }
  0x1d   :  { %18 = vsyncpa [#allocation4], 0  ;;  %1861 = vmatprep.subr.bf16.mxu0 %v3253_v47  ;;  %1902 = vmatprep.subr.bf16.mxu1 %v3381_v48  ;;  %v3261_v55 = vcombine.high %v357_v49, %v361_v50  ;;  %v3389_v56 = vcombine.high %v485_v51, %v489_v52  ;;  %v365_v57 = vld [vmem:[%s5033_s5 + $0x180] sm:$0xff]  ;;  %v3260_v61 = vcombine.low %v357_v49, %v361_v50  ;;  %vm3156_vm6 = vcmask 1041408  }
  0x1e   :  { %v369_v58 = vld [vmem:[%s5033_s5 + $0x1a0] sm:$0xff]  ;;  %1862 = vmatpush1.bf16.msra.mxu0 %v3252_v53  ;;  %1903 = vmatpush1.bf16.msra.mxu1 %v3380_v54  ;;  %v3388_v62 = vcombine.low %v485_v51, %v489_v52 }
  0x1f   :  { %v493_v59 = vld [vmem:[%s5033_s5 + $0x580] sm:$0xff]  ;;  %1863 = vmatprep.subr.bf16.mxu0 %v3261_v55  ;;  %1904 = vmatprep.subr.bf16.mxu1 %v3389_v56  ;;  %v3269_v63 = vcombine.high %v365_v57, %v369_v58  ;;  %v3268_v5 = vcombine.low %v365_v57, %v369_v58 }
  0x20   :  { %v497_v60 = vld [vmem:[%s5033_s5 + $0x5a0] sm:$0xff] }
  0x21   :  { %v3397_v0 = vcombine.high %v493_v59, %v497_v60  ;;  %v373_v1 = vld [vmem:[%s5033_s5 + $0x1c0] sm:$0xff]  ;;  %v3396_v6 = vcombine.low %v493_v59, %v497_v60 }
  0x22   :  { %v377_v2 = vld [vmem:[%s5033_s5 + $0x1e0] sm:$0xff]  ;;  %1864 = vmatpush1.bf16.msra.mxu0 %v3260_v61  ;;  %1905 = vmatpush1.bf16.msra.mxu1 %v3388_v62 }
  0x23   :  { %v501_v3 = vld [vmem:[%s5033_s5 + $0x5c0] sm:$0xff]  ;;  %1865 = vmatprep.subr.bf16.mxu0 %v3269_v63  ;;  %1906 = vmatprep.subr.bf16.mxu1 %v3397_v0  ;;  %v3277_v7 = vcombine.high %v373_v1, %v377_v2  ;;  %v3276_v13 = vcombine.low %v373_v1, %v377_v2 }
  0x24   :  { %v505_v4 = vld [vmem:[%s5033_s5 + $0x5e0] sm:$0xff] }
  0x25   :  { %v3405_v8 = vcombine.high %v501_v3, %v505_v4  ;;  %v381_v9 = vld [vmem:[%s5033_s5 + $0x200] sm:$0xff]  ;;  %v3404_v14 = vcombine.low %v501_v3, %v505_v4 }
  0x26   :  { %v385_v10 = vld [vmem:[%s5033_s5 + $0x220] sm:$0xff]  ;;  %1866 = vmatpush1.bf16.msra.mxu0 %v3268_v5  ;;  %1907 = vmatpush1.bf16.msra.mxu1 %v3396_v6 }
  0x27   :  { %v509_v11 = vld [vmem:[%s5033_s5 + $0x600] sm:$0xff]  ;;  %1867 = vmatprep.subr.bf16.mxu0 %v3277_v7  ;;  %1908 = vmatprep.subr.bf16.mxu1 %v3405_v8  ;;  %v3285_v15 = vcombine.high %v381_v9, %v385_v10  ;;  %v3284_v21 = vcombine.low %v381_v9, %v385_v10 }
  0x28   :  { %v513_v12 = vld [vmem:[%s5033_s5 + $0x620] sm:$0xff] }
  0x29   :  { %v3413_v16 = vcombine.high %v509_v11, %v513_v12  ;;  %v389_v17 = vld [vmem:[%s5033_s5 + $0x240] sm:$0xff]  ;;  %v3412_v22 = vcombine.low %v509_v11, %v513_v12  ;;  %v3913_v11 = vld [vmem:[%s5033_s5 + $0x8] sm:$0xff] }
  0x2a   :  { %v393_v18 = vld [vmem:[%s5033_s5 + $0x260] sm:$0xff]  ;;  %1868 = vmatpush1.bf16.msra.mxu0 %v3276_v13  ;;  %1909 = vmatpush1.bf16.msra.mxu1 %v3404_v14  ;;  %v3918_v12 = vld [vmem:[%s5033_s5 + $0x28] sm:$0xff] }
  0x2b   :  { %v517_v19 = vld [vmem:[%s5033_s5 + $0x640] sm:$0xff]  ;;  %1869 = vmatprep.subr.bf16.mxu0 %v3285_v15  ;;  %1910 = vmatprep.subr.bf16.mxu1 %v3413_v16  ;;  %v3293_v23 = vcombine.high %v389_v17, %v393_v18  ;;  %v3292_v29 = vcombine.low %v389_v17, %v393_v18  ;;  %v3923_v13 = vld [vmem:[%s5033_s5 + $0x408] sm:$0xff]  ;;  %v3222_v14 = vcombine.low %v3913_v11, %v3918_v12 }
  0x2c   :  { %v521_v20 = vld [vmem:[%s5033_s5 + $0x660] sm:$0xff]  ;;  %v3223_v15 = vcombine.high %v3913_v11, %v3918_v12  ;;  %v450_v16 = vld [vmem:[%s5033_s5 + $0x428] sm:$0xff] }
  0x2d   :  { %v3421_v24 = vcombine.high %v517_v19, %v521_v20  ;;  %v397_v25 = vld [vmem:[%s5033_s5 + $0x280] sm:$0xff]  ;;  %v3420_v30 = vcombine.low %v517_v19, %v521_v20  ;;  %v3350_v17 = vcombine.low %v3923_v13, %v450_v16  ;;  %v3351_v18 = vcombine.high %v3923_v13, %v450_v16  ;;  %v350_v12 = vld [vmem:[%s5033_s5 + $0x108] sm:$0xff] }
  0x2e   :  { %v401_v26 = vld [vmem:[%s5033_s5 + $0x2a0] sm:$0xff]  ;;  %1870 = vmatpush1.bf16.msra.mxu0 %v3284_v21  ;;  %1911 = vmatpush1.bf16.msra.mxu1 %v3412_v22  ;;  %v43_v19 = vlaneseq  ;;  %v354_v13 = vld [vmem:[%s5033_s5 + $0x128] sm:$0xff] }
  0x2f   :  { %v525_v27 = vld [vmem:[%s5033_s5 + $0x680] sm:$0xff]  ;;  %1871 = vmatprep.subr.bf16.mxu0 %v3293_v23  ;;  %1912 = vmatprep.subr.bf16.mxu1 %v3421_v24  ;;  %v3301_v31 = vcombine.high %v397_v25, %v401_v26  ;;  %v3300_v37 = vcombine.low %v397_v25, %v401_v26 }
  0x30   :  { %v529_v28 = vld [vmem:[%s5033_s5 + $0x6a0] sm:$0xff]  ;;  %v3934_v20 = vshrl.u32 %v43_v19, 7 }
  0x31   :  { %v3429_v32 = vcombine.high %v525_v27, %v529_v28  ;;  %v405_v33 = vld [vmem:[%s5033_s5 + $0x2c0] sm:$0xff]  ;;  %v3428_v38 = vcombine.low %v525_v27, %v529_v28 }
  0x32   :  { %v409_v34 = vld [vmem:[%s5033_s5 + $0x2e0] sm:$0xff]  ;;  %1872 = vmatpush1.bf16.msra.mxu0 %v3292_v29  ;;  %1913 = vmatpush1.bf16.msra.mxu1 %v3420_v30  ;;  %v3937_v21 = vsub.s32 0, %v3934_v20  ;;  %v3940_v22 = vsub.s32 2, %v3934_v20  ;;  %v3946_v24 = vsub.s32 1, %v3934_v20  ;;  %v3949_v25 = vsub.s32 3, %v3934_v20 }
  0x33   :  { %v533_v35 = vld [vmem:[%s5033_s5 + $0x6c0] sm:$0xff]  ;;  %1873 = vmatprep.subr.bf16.mxu0 %v3301_v31  ;;  %1914 = vmatprep.subr.bf16.mxu1 %v3429_v32  ;;  %v3309_v39 = vcombine.high %v405_v33, %v409_v34  ;;  %v3308_v45 = vcombine.low %v405_v33, %v409_v34 }
  0x34   :  { %v537_v36 = vld [vmem:[%s5033_s5 + $0x6e0] sm:$0xff] }
  0x35   :  { %v3437_v40 = vcombine.high %v533_v35, %v537_v36  ;;  %v413_v41 = vld [vmem:[%s5033_s5 + $0x300] sm:$0xff]  ;;  %v3436_v46 = vcombine.low %v533_v35, %v537_v36 }
  0x36   :  { %v417_v42 = vld [vmem:[%s5033_s5 + $0x320] sm:$0xff]  ;;  %1874 = vmatpush1.bf16.msra.mxu0 %v3300_v37  ;;  %1915 = vmatpush1.bf16.msra.mxu1 %v3428_v38 }
  0x37   :  { %v541_v43 = vld [vmem:[%s5033_s5 + $0x700] sm:$0xff]  ;;  %1875 = vmatprep.subr.bf16.mxu0 %v3309_v39  ;;  %1916 = vmatprep.subr.bf16.mxu1 %v3437_v40  ;;  %v3317_v47 = vcombine.high %v413_v41, %v417_v42  ;;  %v3316_v53 = vcombine.low %v413_v41, %v417_v42 }
  0x38   :  { %v545_v44 = vld [vmem:[%s5033_s5 + $0x720] sm:$0xff] }
  0x39   :  { %v3445_v48 = vcombine.high %v541_v43, %v545_v44  ;;  %v421_v49 = vld [vmem:[%s5033_s5 + $0x340] sm:$0xff]  ;;  %v3444_v54 = vcombine.low %v541_v43, %v545_v44 }
  0x3a   :  { %v425_v50 = vld [vmem:[%s5033_s5 + $0x360] sm:$0xff]  ;;  %1876 = vmatpush1.bf16.msra.mxu0 %v3308_v45  ;;  %1917 = vmatpush1.bf16.msra.mxu1 %v3436_v46 }
  0x3b   :  { %v549_v51 = vld [vmem:[%s5033_s5 + $0x740] sm:$0xff]  ;;  %1877 = vmatprep.subr.bf16.mxu0 %v3317_v47  ;;  %1918 = vmatprep.subr.bf16.mxu1 %v3445_v48  ;;  %v3325_v55 = vcombine.high %v421_v49, %v425_v50  ;;  %v3324_v57 = vcombine.low %v421_v49, %v425_v50  ;;  %v326_v48 = vld [vmem:[%s5033_s5 + $0x48] sm:$0xff] }
  0x3c   :  { %v553_v52 = vld [vmem:[%s5033_s5 + $0x760] sm:$0xff] }
  0x3d   :  { %v3453_v56 = vcombine.high %v549_v51, %v553_v52  ;;  %v3452_v58 = vcombine.low %v549_v51, %v553_v52  ;;  %v429_v59 = vld [vmem:[%s5033_s5 + $0x380] sm:$0xff]  ;;  %v330_v52 = vld [vmem:[%s5033_s5 + $0x68] sm:$0xff] }
  0x3e   :  { %1878 = vmatpush1.bf16.msra.mxu0 %v3316_v53  ;;  %1919 = vmatpush1.bf16.msra.mxu1 %v3444_v54  ;;  %v433_v60 = vld [vmem:[%s5033_s5 + $0x3a0] sm:$0xff]  ;;  %v454_v53 = vld [vmem:[%s5033_s5 + $0x448] sm:$0xff] }
  0x3f   :  { %1879 = vmatprep.subr.bf16.mxu0 %v3325_v55  ;;  %1920 = vmatprep.subr.bf16.mxu1 %v3453_v56  ;;  %v557_v61 = vld [vmem:[%s5033_s5 + $0x780] sm:$0xff]  ;;  %v3333_v62 = vcombine.high %v429_v59, %v433_v60  ;;  %v3332_v0 = vcombine.low %v429_v59, %v433_v60  ;;  %v458_v54 = vld [vmem:[%s5033_s5 + $0x468] sm:$0xff]  ;;  %v3231_v59 = vcombine.high %v326_v48, %v330_v52 }
  0x40   :  { %v561_v63 = vld [vmem:[%s5033_s5 + $0x7a0] sm:$0xff]  ;;  %v3359_v60 = vcombine.high %v454_v53, %v458_v54 }
  0x41   :  { %v3460_v1 = vcombine.low %v557_v61, %v561_v63  ;;  %v3461_v2 = vcombine.high %v557_v61, %v561_v63  ;;  %v437_v3 = vld [vmem:[%s5033_s5 + $0x3c0] sm:$0xff]  ;;  %v338_v61 = vld [vmem:[%s5033_s5 + $0xa8] sm:$0xff] }
  0x42   :  { %1880 = vmatpush1.bf16.msra.mxu0 %v3324_v57  ;;  %1921 = vmatpush1.bf16.msra.mxu1 %v3452_v58  ;;  %v441_v4 = vld [vmem:[%s5033_s5 + $0x3e0] sm:$0xff]  ;;  %v334_v58 = vld [vmem:[%s5033_s5 + $0x88] sm:$0xff] }
  0x43   :  { %1881 = vmatprep.subr.bf16.mxu0 %v3333_v62  ;;  %1922 = vmatprep.subr.bf16.mxu1 %v3461_v2  ;;  %v565_v5 = vld [vmem:[%s5033_s5 + $0x7c0] sm:$0xff]  ;;  %v3341_v6 = vcombine.high %v437_v3, %v441_v4  ;;  %v3340_v8 = vcombine.low %v437_v3, %v441_v4  ;;  %v462_v62 = vld [vmem:[%s5033_s5 + $0x488] sm:$0xff]  ;;  %v3239_v2 = vcombine.high %v334_v58, %v338_v61 }
  0x44   :  { %v569_v7 = vld [vmem:[%s5033_s5 + $0x7e0] sm:$0xff]  ;;  %v466_v63 = vld [vmem:[%s5033_s5 + $0x4a8] sm:$0xff] }
  0x45   :  { %v3468_v9 = vcombine.low %v565_v5, %v569_v7  ;;  %v3469_v10 = vcombine.high %v565_v5, %v569_v7  ;;  %v41_v23 = vld [vmem:[%s5032_s4] sm:$0xf]  ;;  %v3367_v3 = vcombine.high %v462_v62, %v466_v63  ;;  %v342_v4 = vld [vmem:[%s5033_s5 + $0xc8] sm:$0xff] }
  0x46   :  { %1882 = vmatpush1.bf16.msra.mxu0 %v3332_v0  ;;  %1923 = vmatpush1.bf16.msra.mxu1 %v3460_v1  ;;  %v46_v26 = vrot.slane %v41_v23, %v3937_v21  ;;  %v54_v27 = vrot.slane %v41_v23, %v3940_v22  ;;  %v50_v28 = vrot.slane %v41_v23, %v3946_v24  ;;  %v346_v5 = vld [vmem:[%s5033_s5 + $0xe8] sm:$0xff] }
  0x47   :  { %1883 = vmatprep.subr.bf16.mxu0 %v3341_v6  ;;  %1924 = vmatprep.subr.bf16.mxu1 %v3469_v10  ;;  %v58_v29 = vrot.slane %v41_v23, %v3949_v25  ;;  %v3230_v0 = vcombine.low %v326_v48, %v330_v52  ;;  %v3358_v1 = vcombine.low %v454_v53, %v458_v54  ;;  %v470_v6 = vld [vmem:[%s5033_s5 + $0x4c8] sm:$0xff] }
  0x48   :  { %v474_v7 = vld [vmem:[%s5033_s5 + $0x4e8] sm:$0xff]  ;;  %v3247_v10 = vcombine.high %v342_v4, %v346_v5  ;;  %v3246_v16 = vcombine.low %v342_v4, %v346_v5 }
  0x49   :  { %v3375_v11 = vcombine.high %v470_v6, %v474_v7  ;;  %v358_v23 = vld [vmem:[%s5033_s5 + $0x148] sm:$0xff] }
  0x4a   :  { %1884 = vmatpush1.bf16.msra.mxu0 %v3340_v8  ;;  %1925 = vmatpush1.bf16.msra.mxu1 %v3468_v9  ;;  %v3238_v8 = vcombine.low %v334_v58, %v338_v61  ;;  %v3366_v9 = vcombine.low %v462_v62, %v466_v63  ;;  %v510_v52 = vld [vmem:[%s5033_s5 + $0x608] sm:$0xff] }
  0x4b   :  { %1935 = vmatprep.subr.bf16.mxu0 %v3223_v15  ;;  %1976 = vmatprep.subr.bf16.mxu1 %v3351_v18  ;;  %v482_v15 = vld [vmem:[%s5033_s5 + $0x528] sm:$0xff]  ;;  %v3255_v18 = vcombine.high %v350_v12, %v354_v13 }
  0x4c   :  { %v514_v53 = vld [vmem:[%s5033_s5 + $0x628] sm:$0xff] }
  0x4d   :  { %v390_v61 = vld [vmem:[%s5033_s5 + $0x248] sm:$0xff] }
  0x4e   :  { %v394_v62 = vld [vmem:[%s5033_s5 + $0x268] sm:$0xff] }
  0x4f   :  { %v518_v63 = vld [vmem:[%s5033_s5 + $0x648] sm:$0xff] }
  0x50   :  { %v398_v5 = vld [vmem:[%s5033_s5 + $0x288] sm:$0xff] }
  0xe0   :  { %v124_v30 = vpop.f32.mrb[0].mxu0  ;;  %v165_v31 = vpop.f32.mrb[0].mxu1 }
  0xe1   :  { %v125_v32 = vadd.f32 %v124_v30, %v46_v26  ;;  %v166_v33 = vadd.f32 %v165_v31, %v54_v27  ;;  %v126_v34 = vpop.f32.mrb[1].mxu0  ;;  %v167_v35 = vpop.f32.mrb[1].mxu1  ;;  %v362_v26 = vld [vmem:[%s5033_s5 + $0x168] sm:$0xff] }
  0xe2   :  { %v127_v36 = vadd.f32 %v126_v34, %v50_v28  ;;  %v168_v37 = vadd.f32 %v167_v35, %v58_v29  ;;  %v128_v38 = vpop.f32.mrb[2].mxu0  ;;  %v169_v39 = vpop.f32.mrb[2].mxu1  ;;  %v486_v27 = vld [vmem:[%s5033_s5 + $0x548] sm:$0xff]  ;;  %v3254_v29 = vcombine.low %v350_v12, %v354_v13  ;;  %v3263_v31 = vcombine.high %v358_v23, %v362_v26 }
  0xe3   :  { %vm172_vm2 = vcmp.ge.f32.partialorder %v125_v32, 0.0  ;;  %v176_v40 = vmul.f32 0.2, %v125_v32  ;;  %vm174_vm3 = vcmp.ge.f32.partialorder %v166_v33, 0.0  ;;  %v178_v41 = vmul.f32 0.2, %v166_v33 }
  0xe4   :  { %vm173_vm4 = vcmp.ge.f32.partialorder %v127_v36, 0.0  ;;  %v177_v42 = vmul.f32 0.2, %v127_v36  ;;  %vm175_vm5 = vcmp.ge.f32.partialorder %v168_v37, 0.0  ;;  %v179_v43 = vmul.f32 0.2, %v168_v37 }
  0xe5   :  { %v180_v44 = vsel %vm172_vm2, %v125_v32, %v176_v40  ;;  %v182_v45 = vsel %vm174_vm3, %v166_v33, %v178_v41  ;;  %v129_v46 = vpop.f32.mrb[3].mxu0  ;;  %v170_v47 = vpop.f32.mrb[3].mxu1  ;;  %v490_v28 = vld [vmem:[%s5033_s5 + $0x568] sm:$0xff] }
  0xe6   :  { %v3958_v49 = vpack.c.bf16 %v182_v45, %v182_v45  ;;  %v181_v50 = vsel %vm173_vm4, %v127_v36, %v177_v42  ;;  %v183_v51 = vsel %vm175_vm5, %v168_v37, %v179_v43  ;;  %v3973_v57 = vpack.c.bf16 %v180_v44, %v180_v44  ;;  %v366_v33 = vld [vmem:[%s5033_s5 + $0x188] sm:$0xff] }
  0xe7   :  { %v3969_v55 = vpack.c.bf16 %v181_v50, %v181_v50  ;;  %v3971_v56 = vpack.c.bf16 %v183_v51, %v183_v51  ;;  %v3391_v32 = vcombine.high %v486_v27, %v490_v28  ;;  %v370_v34 = vld [vmem:[%s5033_s5 + $0x1a8] sm:$0xff]  ;;  %v3262_v37 = vcombine.low %v358_v23, %v362_v26 }
  0xe8   :  { %v494_v35 = vld [vmem:[%s5033_s5 + $0x588] sm:$0xff]  ;;  %v3390_v38 = vcombine.low %v486_v27, %v490_v28  ;;  %v3271_v39 = vcombine.high %v366_v33, %v370_v34  ;;  %v3270_v45 = vcombine.low %v366_v33, %v370_v34 }
  0xe9   :  { %1885 = vmatprep.mubr.bf16.mxu0 %v3969_v55  ;;  %1926 = vmatprep.mubr.bf16.mxu1 %v3971_v56  ;;  %v498_v36 = vld [vmem:[%s5033_s5 + $0x5a8] sm:$0xff] }
  0xea   :  { %1886 = vmatmul.mubr.bf16.vlgmr.msra.gmra.mrb[4].mxu0 %v3973_v57  ;;  %1927 = vmatmul.mubr.bf16.vlgmr.msra.gmra.mrb[4].mxu1 %v3958_v49  ;;  %v3399_v40 = vcombine.high %v494_v35, %v498_v36  ;;  %v374_v41 = vld [vmem:[%s5033_s5 + $0x1c8] sm:$0xff]  ;;  %v3398_v46 = vcombine.low %v494_v35, %v498_v36 }
  0xeb   :  { %1936 = vmatpush1.bf16.msra.mxu0 %v3222_v14  ;;  %1977 = vmatpush1.bf16.msra.mxu1 %v3350_v17  ;;  %v478_v14 = vld [vmem:[%s5033_s5 + $0x508] sm:$0xff]  ;;  %v3374_v17 = vcombine.low %v470_v6, %v474_v7 }
  0xec   :  { %1967 = vmatprep.mubr.bf16.mxu0 %v3969_v55  ;;  %2008 = vmatprep.mubr.bf16.mxu1 %v3971_v56  ;;  %v3383_v19 = vcombine.high %v478_v14, %v482_v15  ;;  %v3382_v30 = vcombine.low %v478_v14, %v482_v15  ;;  %v378_v42 = vld [vmem:[%s5033_s5 + $0x1e8] sm:$0xff] }
  0xed   :  { %1937 = vmatprep.subr.bf16.mxu0 %v3231_v59  ;;  %1978 = vmatprep.subr.bf16.mxu1 %v3359_v60  ;;  %v502_v43 = vld [vmem:[%s5033_s5 + $0x5c8] sm:$0xff]  ;;  %v3279_v47 = vcombine.high %v374_v41, %v378_v42  ;;  %v3278_v54 = vcombine.low %v374_v41, %v378_v42  ;;  %v3415_v60 = vcombine.high %v510_v52, %v514_v53 }
  0xee   :  { %v506_v44 = vld [vmem:[%s5033_s5 + $0x5e8] sm:$0xff] }
  0xef   :  { %1938 = vmatpush1.bf16.msra.mxu0 %v3230_v0  ;;  %1979 = vmatpush1.bf16.msra.mxu1 %v3358_v1  ;;  %v3407_v48 = vcombine.high %v502_v43, %v506_v44  ;;  %v382_v50 = vld [vmem:[%s5033_s5 + $0x208] sm:$0xff]  ;;  %v3406_v58 = vcombine.low %v502_v43, %v506_v44 }
  0xf0   :  { %1939 = vmatprep.subr.bf16.mxu0 %v3239_v2  ;;  %1980 = vmatprep.subr.bf16.mxu1 %v3367_v3  ;;  %v386_v51 = vld [vmem:[%s5033_s5 + $0x228] sm:$0xff]  ;;  %v3414_v2 = vcombine.low %v510_v52, %v514_v53  ;;  %v3295_v3 = vcombine.high %v390_v61, %v394_v62 }
  0xf1   :  { %v3287_v59 = vcombine.high %v382_v50, %v386_v51  ;;  %v522_v0 = vld [vmem:[%s5033_s5 + $0x668] sm:$0xff]  ;;  %v3286_v1 = vcombine.low %v382_v50, %v386_v51 }
  0xf2   :  { %v3423_v4 = vcombine.high %v518_v63, %v522_v0  ;;  %v402_v6 = vld [vmem:[%s5033_s5 + $0x2a8] sm:$0xff] }
  0xf3   :  { %1940 = vmatpush1.bf16.msra.mxu0 %v3238_v8  ;;  %1981 = vmatpush1.bf16.msra.mxu1 %v3366_v9  ;;  %v526_v7 = vld [vmem:[%s5033_s5 + $0x688] sm:$0xff]  ;;  %v3294_v9 = vcombine.low %v390_v61, %v394_v62  ;;  %v319_v62 = vld [vmem:[%s5033_s5 + $0x10] sm:$0xff] }
  0xf4   :  { %1941 = vmatprep.subr.bf16.mxu0 %v3247_v10  ;;  %1982 = vmatprep.subr.bf16.mxu1 %v3375_v11  ;;  %v530_v8 = vld [vmem:[%s5033_s5 + $0x6a8] sm:$0xff]  ;;  %v3422_v10 = vcombine.low %v518_v63, %v522_v0  ;;  %v3303_v11 = vcombine.high %v398_v5, %v402_v6  ;;  %v323_v63 = vld [vmem:[%s5033_s5 + $0x30] sm:$0xff] }
  0xf5   :  { %v3431_v12 = vcombine.high %v526_v7, %v530_v8  ;;  %v406_v13 = vld [vmem:[%s5033_s5 + $0x2c8] sm:$0xff]  ;;  %v447_v0 = vld [vmem:[%s5033_s5 + $0x410] sm:$0xff] }
  0xf6   :  { %v410_v14 = vld [vmem:[%s5033_s5 + $0x2e8] sm:$0xff] }
  0xf7   :  { %1942 = vmatpush1.bf16.msra.mxu0 %v3246_v16  ;;  %1983 = vmatpush1.bf16.msra.mxu1 %v3374_v17  ;;  %v534_v15 = vld [vmem:[%s5033_s5 + $0x6c8] sm:$0xff]  ;;  %v3302_v17 = vcombine.low %v398_v5, %v402_v6  ;;  %v327_v6 = vld [vmem:[%s5033_s5 + $0x50] sm:$0xff] }
  0xf8   :  { %1943 = vmatprep.subr.bf16.mxu0 %v3255_v18  ;;  %1984 = vmatprep.subr.bf16.mxu1 %v3383_v19  ;;  %v538_v16 = vld [vmem:[%s5033_s5 + $0x6e8] sm:$0xff]  ;;  %v3430_v18 = vcombine.low %v526_v7, %v530_v8  ;;  %v3311_v19 = vcombine.high %v406_v13, %v410_v14  ;;  %v331_v7 = vld [vmem:[%s5033_s5 + $0x70] sm:$0xff] }
  0xf9   :  { %v3439_v23 = vcombine.high %v534_v15, %v538_v16  ;;  %v414_v26 = vld [vmem:[%s5033_s5 + $0x308] sm:$0xff]  ;;  %v455_v8 = vld [vmem:[%s5033_s5 + $0x450] sm:$0xff] }
  0xfa   :  { %v418_v27 = vld [vmem:[%s5033_s5 + $0x328] sm:$0xff] }
  0xfb   :  { %1944 = vmatpush1.bf16.msra.mxu0 %v3254_v29  ;;  %1985 = vmatpush1.bf16.msra.mxu1 %v3382_v30  ;;  %v542_v28 = vld [vmem:[%s5033_s5 + $0x708] sm:$0xff]  ;;  %v3310_v30 = vcombine.low %v406_v13, %v410_v14  ;;  %v335_v14 = vld [vmem:[%s5033_s5 + $0x90] sm:$0xff] }
  0xfc   :  { %1945 = vmatprep.subr.bf16.mxu0 %v3263_v31  ;;  %1986 = vmatprep.subr.bf16.mxu1 %v3391_v32  ;;  %v546_v29 = vld [vmem:[%s5033_s5 + $0x728] sm:$0xff]  ;;  %v3438_v31 = vcombine.low %v534_v15, %v538_v16  ;;  %v3319_v32 = vcombine.high %v414_v26, %v418_v27  ;;  %v339_v15 = vld [vmem:[%s5033_s5 + $0xb0] sm:$0xff] }
  0xfd   :  { %v3447_v33 = vcombine.high %v542_v28, %v546_v29  ;;  %v422_v34 = vld [vmem:[%s5033_s5 + $0x348] sm:$0xff]  ;;  %v463_v16 = vld [vmem:[%s5033_s5 + $0x490] sm:$0xff] }
  0xfe   :  { %v426_v35 = vld [vmem:[%s5033_s5 + $0x368] sm:$0xff] }
  0xff   :  { %1946 = vmatpush1.bf16.msra.mxu0 %v3262_v37  ;;  %1987 = vmatpush1.bf16.msra.mxu1 %v3390_v38  ;;  %v550_v36 = vld [vmem:[%s5033_s5 + $0x748] sm:$0xff]  ;;  %v3318_v38 = vcombine.low %v414_v26, %v418_v27  ;;  %v343_v27 = vld [vmem:[%s5033_s5 + $0xd0] sm:$0xff] }
 0x100   :  { %1947 = vmatprep.subr.bf16.mxu0 %v3271_v39  ;;  %1988 = vmatprep.subr.bf16.mxu1 %v3399_v40  ;;  %v554_v37 = vld [vmem:[%s5033_s5 + $0x768] sm:$0xff]  ;;  %v3446_v39 = vcombine.low %v542_v28, %v546_v29  ;;  %v3327_v40 = vcombine.high %v422_v34, %v426_v35  ;;  %v347_v28 = vld [vmem:[%s5033_s5 + $0xf0] sm:$0xff] }
 0x101   :  { %v3455_v41 = vcombine.high %v550_v36, %v554_v37  ;;  %v430_v42 = vld [vmem:[%s5033_s5 + $0x388] sm:$0xff]  ;;  %v471_v29 = vld [vmem:[%s5033_s5 + $0x4d0] sm:$0xff] }
 0x102   :  { %v434_v43 = vld [vmem:[%s5033_s5 + $0x3a8] sm:$0xff] }
 0x103   :  { %1948 = vmatpush1.bf16.msra.mxu0 %v3270_v45  ;;  %1989 = vmatpush1.bf16.msra.mxu1 %v3398_v46  ;;  %v558_v44 = vld [vmem:[%s5033_s5 + $0x788] sm:$0xff]  ;;  %v3326_v46 = vcombine.low %v422_v34, %v426_v35  ;;  %v351_v35 = vld [vmem:[%s5033_s5 + $0x110] sm:$0xff] }
 0x104   :  { %1949 = vmatprep.subr.bf16.mxu0 %v3279_v47  ;;  %1990 = vmatprep.subr.bf16.mxu1 %v3407_v48  ;;  %v562_v45 = vld [vmem:[%s5033_s5 + $0x7a8] sm:$0xff]  ;;  %v3454_v47 = vcombine.low %v550_v36, %v554_v37  ;;  %v3335_v48 = vcombine.high %v430_v42, %v434_v43  ;;  %v355_v36 = vld [vmem:[%s5033_s5 + $0x130] sm:$0xff] }
 0x105   :  { %v3463_v50 = vcombine.high %v558_v44, %v562_v45  ;;  %v438_v51 = vld [vmem:[%s5033_s5 + $0x3c8] sm:$0xff]  ;;  %v479_v37 = vld [vmem:[%s5033_s5 + $0x510] sm:$0xff] }
 0x106   :  { %v442_v52 = vld [vmem:[%s5033_s5 + $0x3e8] sm:$0xff] }
 0x107   :  { %1950 = vmatpush1.bf16.msra.mxu0 %v3278_v54  ;;  %1991 = vmatpush1.bf16.msra.mxu1 %v3406_v58  ;;  %v566_v53 = vld [vmem:[%s5033_s5 + $0x7c8] sm:$0xff]  ;;  %v3334_v58 = vcombine.low %v430_v42, %v434_v43  ;;  %v359_v43 = vld [vmem:[%s5033_s5 + $0x150] sm:$0xff] }
 0x108   :  { %1951 = vmatprep.subr.bf16.mxu0 %v3287_v59  ;;  %1992 = vmatprep.subr.bf16.mxu1 %v3415_v60  ;;  %v570_v54 = vld [vmem:[%s5033_s5 + $0x7e8] sm:$0xff]  ;;  %v3462_v59 = vcombine.low %v558_v44, %v562_v45  ;;  %v3343_v60 = vcombine.high %v438_v51, %v442_v52  ;;  %v363_v44 = vld [vmem:[%s5033_s5 + $0x170] sm:$0xff] }
 0x109   :  { %v3471_v61 = vcombine.high %v566_v53, %v570_v54  ;;  %v487_v45 = vld [vmem:[%s5033_s5 + $0x550] sm:$0xff] }
 0x10b   :  { %1952 = vmatpush1.bf16.msra.mxu0 %v3286_v1  ;;  %1993 = vmatpush1.bf16.msra.mxu1 %v3414_v2  ;;  %v451_v1 = vld [vmem:[%s5033_s5 + $0x430] sm:$0xff]  ;;  %v3342_v2 = vcombine.low %v438_v51, %v442_v52 }
 0x10c   :  { %1953 = vmatprep.subr.bf16.mxu0 %v3295_v3  ;;  %1994 = vmatprep.subr.bf16.mxu1 %v3423_v4  ;;  %v3470_v3 = vcombine.low %v566_v53, %v570_v54  ;;  %v3225_v4 = vcombine.high %v319_v62, %v323_v63  ;;  %v3353_v5 = vcombine.high %v447_v0, %v451_v1  ;;  %v367_v52 = vld [vmem:[%s5033_s5 + $0x190] sm:$0xff] }
 0x10d   :  { %v371_v53 = vld [vmem:[%s5033_s5 + $0x1b0] sm:$0xff] }
 0x10e   :  { %v495_v54 = vld [vmem:[%s5033_s5 + $0x590] sm:$0xff] }
 0x10f   :  { %1954 = vmatpush1.bf16.msra.mxu0 %v3294_v9  ;;  %1995 = vmatpush1.bf16.msra.mxu1 %v3422_v10  ;;  %v459_v9 = vld [vmem:[%s5033_s5 + $0x470] sm:$0xff]  ;;  %v3224_v10 = vcombine.low %v319_v62, %v323_v63 }
 0x110   :  { %1955 = vmatprep.subr.bf16.mxu0 %v3303_v11  ;;  %1996 = vmatprep.subr.bf16.mxu1 %v3431_v12  ;;  %v3352_v11 = vcombine.low %v447_v0, %v451_v1  ;;  %v3233_v12 = vcombine.high %v327_v6, %v331_v7  ;;  %v3361_v13 = vcombine.high %v455_v8, %v459_v9  ;;  %v375_v63 = vld [vmem:[%s5033_s5 + $0x1d0] sm:$0xff] }
 0x111   :  { %v379_v0 = vld [vmem:[%s5033_s5 + $0x1f0] sm:$0xff] }
 0x112   :  { %v503_v1 = vld [vmem:[%s5033_s5 + $0x5d0] sm:$0xff] }
 0x113   :  { %1956 = vmatpush1.bf16.msra.mxu0 %v3302_v17  ;;  %1997 = vmatpush1.bf16.msra.mxu1 %v3430_v18  ;;  %v467_v17 = vld [vmem:[%s5033_s5 + $0x4b0] sm:$0xff]  ;;  %v3232_v18 = vcombine.low %v327_v6, %v331_v7 }
 0x114   :  { %1957 = vmatprep.subr.bf16.mxu0 %v3311_v19  ;;  %1998 = vmatprep.subr.bf16.mxu1 %v3439_v23  ;;  %v3360_v19 = vcombine.low %v455_v8, %v459_v9  ;;  %v3241_v23 = vcombine.high %v335_v14, %v339_v15  ;;  %v3369_v26 = vcombine.high %v463_v16, %v467_v17  ;;  %v383_v7 = vld [vmem:[%s5033_s5 + $0x210] sm:$0xff] }
 0x115   :  { %v387_v8 = vld [vmem:[%s5033_s5 + $0x230] sm:$0xff] }
 0x116   :  { %v511_v9 = vld [vmem:[%s5033_s5 + $0x610] sm:$0xff] }
 0x117   :  { %1958 = vmatpush1.bf16.msra.mxu0 %v3310_v30  ;;  %1999 = vmatpush1.bf16.msra.mxu1 %v3438_v31  ;;  %v475_v30 = vld [vmem:[%s5033_s5 + $0x4f0] sm:$0xff]  ;;  %v3240_v31 = vcombine.low %v335_v14, %v339_v15 }
 0x118   :  { %1959 = vmatprep.subr.bf16.mxu0 %v3319_v32  ;;  %2000 = vmatprep.subr.bf16.mxu1 %v3447_v33  ;;  %v3368_v32 = vcombine.low %v463_v16, %v467_v17  ;;  %v3249_v33 = vcombine.high %v343_v27, %v347_v28  ;;  %v3377_v34 = vcombine.high %v471_v29, %v475_v30  ;;  %v391_v15 = vld [vmem:[%s5033_s5 + $0x250] sm:$0xff] }
 0x119   :  { %v395_v16 = vld [vmem:[%s5033_s5 + $0x270] sm:$0xff] }
 0x11a   :  { %v519_v17 = vld [vmem:[%s5033_s5 + $0x650] sm:$0xff] }
 0x11b   :  { %1960 = vmatpush1.bf16.msra.mxu0 %v3318_v38  ;;  %2001 = vmatpush1.bf16.msra.mxu1 %v3446_v39  ;;  %v483_v38 = vld [vmem:[%s5033_s5 + $0x530] sm:$0xff]  ;;  %v3248_v39 = vcombine.low %v343_v27, %v347_v28 }
 0x11c   :  { %1961 = vmatprep.subr.bf16.mxu0 %v3327_v40  ;;  %2002 = vmatprep.subr.bf16.mxu1 %v3455_v41  ;;  %v3376_v40 = vcombine.low %v471_v29, %v475_v30  ;;  %v3257_v41 = vcombine.high %v351_v35, %v355_v36  ;;  %v3385_v42 = vcombine.high %v479_v37, %v483_v38  ;;  %v399_v28 = vld [vmem:[%s5033_s5 + $0x290] sm:$0xff] }
 0x11d   :  { %v403_v29 = vld [vmem:[%s5033_s5 + $0x2b0] sm:$0xff] }
 0x11e   :  { %v527_v30 = vld [vmem:[%s5033_s5 + $0x690] sm:$0xff] }
 0x11f   :  { %1962 = vmatpush1.bf16.msra.mxu0 %v3326_v46  ;;  %2003 = vmatpush1.bf16.msra.mxu1 %v3454_v47  ;;  %v491_v46 = vld [vmem:[%s5033_s5 + $0x570] sm:$0xff]  ;;  %v3256_v47 = vcombine.low %v351_v35, %v355_v36 }
 0x120   :  { %1963 = vmatprep.subr.bf16.mxu0 %v3335_v48  ;;  %2004 = vmatprep.subr.bf16.mxu1 %v3463_v50  ;;  %v3384_v48 = vcombine.low %v479_v37, %v483_v38  ;;  %v3265_v50 = vcombine.high %v359_v43, %v363_v44  ;;  %v3393_v51 = vcombine.high %v487_v45, %v491_v46  ;;  %v407_v36 = vld [vmem:[%s5033_s5 + $0x2d0] sm:$0xff] }
 0x121   :  { %v411_v37 = vld [vmem:[%s5033_s5 + $0x2f0] sm:$0xff] }
 0x122   :  { %v535_v38 = vld [vmem:[%s5033_s5 + $0x6d0] sm:$0xff] }
 0x123   :  { %1964 = vmatpush1.bf16.msra.mxu0 %v3334_v58  ;;  %2005 = vmatpush1.bf16.msra.mxu1 %v3462_v59  ;;  %v499_v58 = vld [vmem:[%s5033_s5 + $0x5b0] sm:$0xff]  ;;  %v3264_v59 = vcombine.low %v359_v43, %v363_v44 }
 0x124   :  { %1965 = vmatprep.subr.bf16.mxu0 %v3343_v60  ;;  %2006 = vmatprep.subr.bf16.mxu1 %v3471_v61  ;;  %v3392_v60 = vcombine.low %v487_v45, %v491_v46  ;;  %v3273_v61 = vcombine.high %v367_v52, %v371_v53  ;;  %v3401_v62 = vcombine.high %v495_v54, %v499_v58  ;;  %v415_v44 = vld [vmem:[%s5033_s5 + $0x310] sm:$0xff] }
 0x125   :  { %v419_v45 = vld [vmem:[%s5033_s5 + $0x330] sm:$0xff] }
 0x126   :  { %v543_v46 = vld [vmem:[%s5033_s5 + $0x710] sm:$0xff] }
 0x127   :  { %1966 = vmatpush1.bf16.msra.mxu0 %v3342_v2  ;;  %2007 = vmatpush1.bf16.msra.mxu1 %v3470_v3  ;;  %v507_v2 = vld [vmem:[%s5033_s5 + $0x5f0] sm:$0xff]  ;;  %v3272_v3 = vcombine.low %v367_v52, %v371_v53 }
 0x128   :  { %2017 = vmatprep.subr.bf16.mxu0 %v3225_v4  ;;  %2058 = vmatprep.subr.bf16.mxu1 %v3353_v5  ;;  %v3400_v4 = vcombine.low %v495_v54, %v499_v58  ;;  %v3281_v5 = vcombine.high %v375_v63, %v379_v0  ;;  %v3409_v6 = vcombine.high %v503_v1, %v507_v2  ;;  %v423_v53 = vld [vmem:[%s5033_s5 + $0x350] sm:$0xff] }
 0x129   :  { %v427_v54 = vld [vmem:[%s5033_s5 + $0x370] sm:$0xff] }
 0x12a   :  { %1968 = vmatmul.mubr.bf16.vlgmr.msra.gmra.mrb[8].mxu0 %v3973_v57  ;;  %2009 = vmatmul.mubr.bf16.vlgmr.msra.gmra.mrb[8].mxu1 %v3958_v49  ;;  %v551_v58 = vld [vmem:[%s5033_s5 + $0x750] sm:$0xff] }
 0x12b   :  { %2018 = vmatpush1.bf16.msra.mxu0 %v3224_v10  ;;  %2049 = vmatprep.mubr.bf16.mxu0 %v3969_v55  ;;  %v515_v10 = vld [vmem:[%s5033_s5 + $0x630] sm:$0xff] }
 0x12c   :  { %2059 = vmatpush1.bf16.msra.mxu1 %v3352_v11  ;;  %2090 = vmatprep.mubr.bf16.mxu1 %v3971_v56  ;;  %v3280_v11 = vcombine.low %v375_v63, %v379_v0  ;;  %v3417_v14 = vcombine.high %v511_v9, %v515_v10  ;;  %v431_v0 = vld [vmem:[%s5033_s5 + $0x390] sm:$0xff] }
 0x12d   :  { %2019 = vmatprep.subr.bf16.mxu0 %v3233_v12  ;;  %2060 = vmatprep.subr.bf16.mxu1 %v3361_v13  ;;  %v3408_v12 = vcombine.low %v503_v1, %v507_v2  ;;  %v3289_v13 = vcombine.high %v383_v7, %v387_v8  ;;  %v435_v1 = vld [vmem:[%s5033_s5 + $0x3b0] sm:$0xff] }
 0x12e   :  { %v559_v2 = vld [vmem:[%s5033_s5 + $0x790] sm:$0xff] }
 0x12f   :  { %2020 = vmatpush1.bf16.msra.mxu0 %v3232_v18  ;;  %v523_v18 = vld [vmem:[%s5033_s5 + $0x670] sm:$0xff] }
 0x130   :  { %2061 = vmatpush1.bf16.msra.mxu1 %v3360_v19  ;;  %2021 = vmatprep.subr.bf16.mxu0 %v3241_v23  ;;  %v3288_v19 = vcombine.low %v383_v7, %v387_v8  ;;  %v3416_v23 = vcombine.low %v511_v9, %v515_v10  ;;  %v3425_v27 = vcombine.high %v519_v17, %v523_v18  ;;  %v439_v8 = vld [vmem:[%s5033_s5 + $0x3d0] sm:$0xff] }
 0x131   :  { %2062 = vmatprep.subr.bf16.mxu1 %v3369_v26  ;;  %v3297_v26 = vcombine.high %v391_v15, %v395_v16  ;;  %v443_v9 = vld [vmem:[%s5033_s5 + $0x3f0] sm:$0xff] }
 0x132   :  { %v567_v10 = vld [vmem:[%s5033_s5 + $0x7d0] sm:$0xff] }
 0x133   :  { %2022 = vmatpush1.bf16.msra.mxu0 %v3240_v31  ;;  %v531_v31 = vld [vmem:[%s5033_s5 + $0x6b0] sm:$0xff] }
 0x134   :  { %2063 = vmatpush1.bf16.msra.mxu1 %v3368_v32  ;;  %2023 = vmatprep.subr.bf16.mxu0 %v3249_v33  ;;  %v3296_v32 = vcombine.low %v391_v15, %v395_v16  ;;  %v3424_v33 = vcombine.low %v519_v17, %v523_v18  ;;  %v3433_v35 = vcombine.high %v527_v30, %v531_v31  ;;  %v320_v16 = vld [vmem:[%s5033_s5 + $0x18] sm:$0xff] }
 0x135   :  { %2064 = vmatprep.subr.bf16.mxu1 %v3377_v34  ;;  %v3305_v34 = vcombine.high %v399_v28, %v403_v29  ;;  %v324_v17 = vld [vmem:[%s5033_s5 + $0x38] sm:$0xff] }
 0x136   :  { %v448_v18 = vld [vmem:[%s5033_s5 + $0x418] sm:$0xff] }
 0x137   :  { %2024 = vmatpush1.bf16.msra.mxu0 %v3248_v39  ;;  %v539_v39 = vld [vmem:[%s5033_s5 + $0x6f0] sm:$0xff] }
 0x138   :  { %2065 = vmatpush1.bf16.msra.mxu1 %v3376_v40  ;;  %2025 = vmatprep.subr.bf16.mxu0 %v3257_v41  ;;  %v3304_v40 = vcombine.low %v399_v28, %v403_v29  ;;  %v3432_v41 = vcombine.low %v527_v30, %v531_v31  ;;  %v3441_v43 = vcombine.high %v535_v38, %v539_v39  ;;  %v328_v29 = vld [vmem:[%s5033_s5 + $0x58] sm:$0xff] }
 0x139   :  { %2066 = vmatprep.subr.bf16.mxu1 %v3385_v42  ;;  %v3313_v42 = vcombine.high %v407_v36, %v411_v37  ;;  %v332_v30 = vld [vmem:[%s5033_s5 + $0x78] sm:$0xff]  ;;  %v3226_v31 = vcombine.low %v320_v16, %v324_v17 }
 0x13b   :  { %2026 = vmatpush1.bf16.msra.mxu0 %v3256_v47  ;;  %v547_v47 = vld [vmem:[%s5033_s5 + $0x730] sm:$0xff] }
 0x13c   :  { %2067 = vmatpush1.bf16.msra.mxu1 %v3384_v48  ;;  %2027 = vmatprep.subr.bf16.mxu0 %v3265_v50  ;;  %v3312_v48 = vcombine.low %v407_v36, %v411_v37  ;;  %v3440_v50 = vcombine.low %v535_v38, %v539_v39  ;;  %v3449_v52 = vcombine.high %v543_v46, %v547_v47  ;;  %v336_v36 = vld [vmem:[%s5033_s5 + $0x98] sm:$0xff] }
 0x13d   :  { %2068 = vmatprep.subr.bf16.mxu1 %v3393_v51  ;;  %v3321_v51 = vcombine.high %v415_v44, %v419_v45  ;;  %v340_v37 = vld [vmem:[%s5033_s5 + $0xb8] sm:$0xff] }
 0x13e   :  { %v464_v39 = vld [vmem:[%s5033_s5 + $0x498] sm:$0xff] }
 0x13f   :  { %2028 = vmatpush1.bf16.msra.mxu0 %v3264_v59  ;;  %v555_v59 = vld [vmem:[%s5033_s5 + $0x770] sm:$0xff] }
 0x140   :  { %2069 = vmatpush1.bf16.msra.mxu1 %v3392_v60  ;;  %2029 = vmatprep.subr.bf16.mxu0 %v3273_v61  ;;  %v3320_v60 = vcombine.low %v415_v44, %v419_v45  ;;  %v3448_v61 = vcombine.low %v543_v46, %v547_v47  ;;  %v3457_v63 = vcombine.high %v551_v58, %v555_v59  ;;  %v344_v45 = vld [vmem:[%s5033_s5 + $0xd8] sm:$0xff] }
 0x141   :  { %2070 = vmatprep.subr.bf16.mxu1 %v3401_v62  ;;  %v3329_v62 = vcombine.high %v423_v53, %v427_v54  ;;  %v348_v46 = vld [vmem:[%s5033_s5 + $0xf8] sm:$0xff] }
 0x142   :  { %v476_v47 = vld [vmem:[%s5033_s5 + $0x4f8] sm:$0xff] }
 0x143   :  { %2030 = vmatpush1.bf16.msra.mxu0 %v3272_v3  ;;  %v563_v3 = vld [vmem:[%s5033_s5 + $0x7b0] sm:$0xff] }
 0x144   :  { %2071 = vmatpush1.bf16.msra.mxu1 %v3400_v4  ;;  %2031 = vmatprep.subr.bf16.mxu0 %v3281_v5  ;;  %v3328_v4 = vcombine.low %v423_v53, %v427_v54  ;;  %v3456_v5 = vcombine.low %v551_v58, %v555_v59  ;;  %v3465_v7 = vcombine.high %v559_v2, %v563_v3  ;;  %v356_v53 = vld [vmem:[%s5033_s5 + $0x138] sm:$0xff] }
 0x145   :  { %2072 = vmatprep.subr.bf16.mxu1 %v3409_v6  ;;  %v3337_v6 = vcombine.high %v431_v0, %v435_v1  ;;  %v480_v54 = vld [vmem:[%s5033_s5 + $0x518] sm:$0xff]  ;;  %v3250_v59 = vcombine.low %v344_v45, %v348_v46 }
 0x146   :  { %v484_v58 = vld [vmem:[%s5033_s5 + $0x538] sm:$0xff] }
 0x147   :  { %2032 = vmatpush1.bf16.msra.mxu0 %v3280_v11  ;;  %v571_v11 = vld [vmem:[%s5033_s5 + $0x7f0] sm:$0xff] }
 0x148   :  { %2073 = vmatpush1.bf16.msra.mxu1 %v3408_v12  ;;  %2033 = vmatprep.subr.bf16.mxu0 %v3289_v13  ;;  %v3336_v12 = vcombine.low %v431_v0, %v435_v1  ;;  %v3464_v13 = vcombine.low %v559_v2, %v563_v3  ;;  %v3473_v15 = vcombine.high %v567_v10, %v571_v11  ;;  %v364_v0 = vld [vmem:[%s5033_s5 + $0x178] sm:$0xff] }
 0x149   :  { %2074 = vmatprep.subr.bf16.mxu1 %v3417_v14  ;;  %v3345_v14 = vcombine.high %v439_v8, %v443_v9  ;;  %v488_v1 = vld [vmem:[%s5033_s5 + $0x558] sm:$0xff] }
 0x14a   :  { %v492_v2 = vld [vmem:[%s5033_s5 + $0x578] sm:$0xff] }
 0x14b   :  { %2034 = vmatpush1.bf16.msra.mxu0 %v3288_v19  ;;  %v452_v19 = vld [vmem:[%s5033_s5 + $0x438] sm:$0xff] }
 0x14c   :  { %2075 = vmatpush1.bf16.msra.mxu1 %v3416_v23  ;;  %2035 = vmatprep.subr.bf16.mxu0 %v3297_v26  ;;  %v3344_v23 = vcombine.low %v439_v8, %v443_v9  ;;  %v3472_v26 = vcombine.low %v567_v10, %v571_v11  ;;  %v3355_v28 = vcombine.high %v448_v18, %v452_v19  ;;  %v372_v8 = vld [vmem:[%s5033_s5 + $0x1b8] sm:$0xff] }
 0x14d   :  { %2076 = vmatprep.subr.bf16.mxu1 %v3425_v27  ;;  %v3227_v27 = vcombine.high %v320_v16, %v324_v17  ;;  %v496_v9 = vld [vmem:[%s5033_s5 + $0x598] sm:$0xff] }
 0x14e   :  { %v500_v10 = vld [vmem:[%s5033_s5 + $0x5b8] sm:$0xff] }
 0x14f   :  { %2036 = vmatpush1.bf16.msra.mxu0 %v3296_v32  ;;  %v456_v32 = vld [vmem:[%s5033_s5 + $0x458] sm:$0xff] }
 0x150   :  { %2077 = vmatpush1.bf16.msra.mxu1 %v3424_v33  ;;  %2037 = vmatprep.subr.bf16.mxu0 %v3305_v34  ;;  %v460_v33 = vld [vmem:[%s5033_s5 + $0x478] sm:$0xff]  ;;  %v3354_v34 = vcombine.low %v448_v18, %v452_v19 }
 0x151   :  { %2078 = vmatprep.subr.bf16.mxu1 %v3433_v35  ;;  %v3235_v35 = vcombine.high %v328_v29, %v332_v30  ;;  %v3363_v38 = vcombine.high %v456_v32, %v460_v33  ;;  %v380_v16 = vld [vmem:[%s5033_s5 + $0x1f8] sm:$0xff] }
 0x152   :  { %v504_v17 = vld [vmem:[%s5033_s5 + $0x5d8] sm:$0xff] }
 0x153   :  { %2038 = vmatpush1.bf16.msra.mxu0 %v3304_v40  ;;  %v468_v40 = vld [vmem:[%s5033_s5 + $0x4b8] sm:$0xff] }
 0x154   :  { %2079 = vmatpush1.bf16.msra.mxu1 %v3432_v41  ;;  %2039 = vmatprep.subr.bf16.mxu0 %v3313_v42  ;;  %v3234_v41 = vcombine.low %v328_v29, %v332_v30  ;;  %v3362_v42 = vcombine.low %v456_v32, %v460_v33  ;;  %v3371_v44 = vcombine.high %v464_v39, %v468_v40  ;;  %v508_v18 = vld [vmem:[%s5033_s5 + $0x5f8] sm:$0xff] }
 0x155   :  { %2080 = vmatprep.subr.bf16.mxu1 %v3441_v43  ;;  %v3243_v43 = vcombine.high %v336_v36, %v340_v37  ;;  %v388_v29 = vld [vmem:[%s5033_s5 + $0x238] sm:$0xff]  ;;  %v3410_v33 = vcombine.low %v504_v17, %v508_v18 }
 0x156   :  { %v512_v30 = vld [vmem:[%s5033_s5 + $0x618] sm:$0xff] }
 0x157   :  { %2040 = vmatpush1.bf16.msra.mxu0 %v3312_v48  ;;  %v3370_v48 = vcombine.low %v464_v39, %v468_v40  ;;  %v524_v39 = vld [vmem:[%s5033_s5 + $0x678] sm:$0xff] }
 0x158   :  { %2081 = vmatpush1.bf16.msra.mxu1 %v3440_v50  ;;  %2041 = vmatprep.subr.bf16.mxu0 %v3321_v51  ;;  %v3251_v50 = vcombine.high %v344_v45, %v348_v46  ;;  %v404_v45 = vld [vmem:[%s5033_s5 + $0x2b8] sm:$0xff] }
 0x159   :  { %2082 = vmatprep.subr.bf16.mxu1 %v3449_v52  ;;  %v352_v52 = vld [vmem:[%s5033_s5 + $0x118] sm:$0xff] }
 0x15a   :  { %v3258_v3 = vcombine.low %v352_v52, %v356_v53  ;;  %v528_v46 = vld [vmem:[%s5033_s5 + $0x698] sm:$0xff] }
 0x15b   :  { %2042 = vmatpush1.bf16.msra.mxu0 %v3320_v60 }
 0x15c   :  { %2083 = vmatpush1.bf16.msra.mxu1 %v3448_v61  ;;  %2043 = vmatprep.subr.bf16.mxu0 %v3329_v62  ;;  %v3259_v61 = vcombine.high %v352_v52, %v356_v53  ;;  %v3387_v62 = vcombine.high %v480_v54, %v484_v58  ;;  %v412_v52 = vld [vmem:[%s5033_s5 + $0x2f8] sm:$0xff] }
 0x15d   :  { %2084 = vmatprep.subr.bf16.mxu1 %v3457_v63  ;;  %v360_v63 = vld [vmem:[%s5033_s5 + $0x158] sm:$0xff] }
 0x15e   :  { %v3266_v11 = vcombine.low %v360_v63, %v364_v0  ;;  %v536_v53 = vld [vmem:[%s5033_s5 + $0x6d8] sm:$0xff] }
 0x15f   :  { %2044 = vmatpush1.bf16.msra.mxu0 %v3328_v4  ;;  %v3386_v4 = vcombine.low %v480_v54, %v484_v58  ;;  %v540_v54 = vld [vmem:[%s5033_s5 + $0x6f8] sm:$0xff] }
 0x160   :  { %2085 = vmatpush1.bf16.msra.mxu1 %v3456_v5  ;;  %2045 = vmatprep.subr.bf16.mxu0 %v3337_v6  ;;  %v3267_v5 = vcombine.high %v360_v63, %v364_v0  ;;  %v3395_v6 = vcombine.high %v488_v1, %v492_v2  ;;  %v420_v63 = vld [vmem:[%s5033_s5 + $0x338] sm:$0xff] }
 0x161   :  { %2086 = vmatprep.subr.bf16.mxu1 %v3465_v7  ;;  %v368_v7 = vld [vmem:[%s5033_s5 + $0x198] sm:$0xff] }
 0x162   :  { %v3274_v19 = vcombine.low %v368_v7, %v372_v8  ;;  %v544_v0 = vld [vmem:[%s5033_s5 + $0x718] sm:$0xff] }
 0x163   :  { %2046 = vmatpush1.bf16.msra.mxu0 %v3336_v12  ;;  %v3394_v12 = vcombine.low %v488_v1, %v492_v2  ;;  %v548_v1 = vld [vmem:[%s5033_s5 + $0x738] sm:$0xff] }
 0x164   :  { %2087 = vmatpush1.bf16.msra.mxu1 %v3464_v13  ;;  %2047 = vmatprep.subr.bf16.mxu0 %v3345_v14  ;;  %v3275_v13 = vcombine.high %v368_v7, %v372_v8  ;;  %v3403_v14 = vcombine.high %v496_v9, %v500_v10  ;;  %v428_v7 = vld [vmem:[%s5033_s5 + $0x378] sm:$0xff] }
 0x165   :  { %2088 = vmatprep.subr.bf16.mxu1 %v3473_v15  ;;  %v376_v15 = vld [vmem:[%s5033_s5 + $0x1d8] sm:$0xff] }
 0x166   :  { %v3282_v32 = vcombine.low %v376_v15, %v380_v16  ;;  %v552_v8 = vld [vmem:[%s5033_s5 + $0x758] sm:$0xff] }
 0x167   :  { %2048 = vmatpush1.bf16.msra.mxu0 %v3344_v23  ;;  %v3402_v23 = vcombine.low %v496_v9, %v500_v10  ;;  %v556_v9 = vld [vmem:[%s5033_s5 + $0x778] sm:$0xff] }
 0x168   :  { %2089 = vmatpush1.bf16.msra.mxu1 %v3472_v26  ;;  %2099 = vmatprep.subr.bf16.mxu0 %v3227_v27  ;;  %v3283_v26 = vcombine.high %v376_v15, %v380_v16  ;;  %v3411_v27 = vcombine.high %v504_v17, %v508_v18  ;;  %v436_v15 = vld [vmem:[%s5033_s5 + $0x3b8] sm:$0xff] }
 0x169   :  { %2140 = vmatprep.subr.bf16.mxu1 %v3355_v28  ;;  %v384_v28 = vld [vmem:[%s5033_s5 + $0x218] sm:$0xff] }
 0x16a   :  { %2050 = vmatmul.mubr.bf16.vlgmr.msra.gmra.mrb[12].mxu0 %v3973_v57  ;;  %v3290_v40 = vcombine.low %v384_v28, %v388_v29  ;;  %v560_v16 = vld [vmem:[%s5033_s5 + $0x798] sm:$0xff] }
 0x16b   :  { %2091 = vmatmul.mubr.bf16.vlgmr.msra.gmra.mrb[12].mxu1 %v3958_v49  ;;  %2100 = vmatpush1.bf16.msra.mxu0 %v3226_v31  ;;  %v516_v31 = vld [vmem:[%s5033_s5 + $0x638] sm:$0xff] }
 0x16c   :  { %2131 = vmatprep.mubr.bf16.mxu0 %v3969_v55  ;;  %2141 = vmatpush1.bf16.msra.mxu1 %v3354_v34  ;;  %v472_v55 = vld [vmem:[%s5033_s5 + $0x4d8] sm:$0xff]  ;;  %v3291_v34 = vcombine.high %v384_v28, %v388_v29  ;;  %v3644_v29 = vmov 1966171168  }
 0x16d   :  { %2172 = vmatprep.mubr.bf16.mxu1 %v3971_v56  ;;  %2101 = vmatprep.subr.bf16.mxu0 %v3235_v35  ;;  %v3242_v56 = vcombine.low %v336_v36, %v340_v37  ;;  %v3379_v51 = vcombine.high %v472_v55, %v476_v47  ;;  %v3378_v60 = vcombine.low %v472_v55, %v476_v47  ;;  %v392_v36 = vld [vmem:[%s5033_s5 + $0x258] sm:$0xff] }
 0x16e   :  { %2142 = vmatprep.subr.bf16.mxu1 %v3363_v38  ;;  %v3419_v35 = vcombine.high %v512_v30, %v516_v31  ;;  %v396_v37 = vld [vmem:[%s5033_s5 + $0x278] sm:$0xff] }
 0x16f   :  { %2102 = vmatpush1.bf16.msra.mxu0 %v3234_v41  ;;  %v520_v38 = vld [vmem:[%s5033_s5 + $0x658] sm:$0xff]  ;;  %v3418_v41 = vcombine.low %v512_v30, %v516_v31  ;;  %v3298_v47 = vcombine.low %v392_v36, %v396_v37  ;;  %v2191_v30 = vunpack.c.l.s4 %v3644_v29 }
 0x170   :  { %2143 = vmatpush1.bf16.msra.mxu1 %v3362_v42  ;;  %2103 = vmatprep.subr.bf16.mxu0 %v3243_v43  ;;  %v3299_v42 = vcombine.high %v392_v36, %v396_v37  ;;  %v3427_v43 = vcombine.high %v520_v38, %v524_v39  ;;  %v532_v55 = vld [vmem:[%s5033_s5 + $0x6b8] sm:$0xff]  ;;  %v185_v37 = vld [vmem:[%s5030_s2] sm:$0xff] }
 0x171   :  { %2144 = vmatprep.subr.bf16.mxu1 %v3371_v44  ;;  %v400_v44 = vld [vmem:[%s5033_s5 + $0x298] sm:$0xff] }
 0x172   :  { %v3306_v58 = vcombine.low %v400_v44, %v404_v45  ;;  %v564_v17 = vld [vmem:[%s5033_s5 + $0x7b8] sm:$0xff] }
 0x173   :  { %2104 = vmatpush1.bf16.msra.mxu0 %v3242_v56  ;;  %v3426_v56 = vcombine.low %v520_v38, %v524_v39  ;;  %v444_v28 = vld [vmem:[%s5033_s5 + $0x3f8] sm:$0xff]  ;;  %v189_v38 = vld [vmem:[%s5030_s2 + $0x20] sm:$0xff]  ;;  %v2192_v39 = vunpack.c.0.s8 %v2191_v30 }
 0x174   :  { %2145 = vmatpush1.bf16.msra.mxu1 %v3370_v48  ;;  %2105 = vmatprep.subr.bf16.mxu0 %v3251_v50  ;;  %v3307_v48 = vcombine.high %v400_v44, %v404_v45  ;;  %v3435_v50 = vcombine.high %v528_v46, %v532_v55  ;;  %v568_v31 = vld [vmem:[%s5033_s5 + $0x7d8] sm:$0xff]  ;;  %v3478_v45 = vcombine.high %v185_v37, %v189_v38 }
 0x175   :  { %2146 = vmatprep.subr.bf16.mxu1 %v3379_v51  ;;  %v408_v51 = vld [vmem:[%s5033_s5 + $0x2d8] sm:$0xff] }
 0x176   :  { %v3314_v2 = vcombine.low %v408_v51, %v412_v52 }
 0x177   :  { %2106 = vmatpush1.bf16.msra.mxu0 %v3250_v59  ;;  %v3434_v59 = vcombine.low %v528_v46, %v532_v55  ;;  %v193_v55 = vld [vmem:[%s5030_s2 + $0x40] sm:$0xff] }
 0x178   :  { %2147 = vmatpush1.bf16.msra.mxu1 %v3378_v60  ;;  %2107 = vmatprep.subr.bf16.mxu0 %v3259_v61  ;;  %v3315_v60 = vcombine.high %v408_v51, %v412_v52  ;;  %v3443_v61 = vcombine.high %v536_v53, %v540_v54  ;;  %v198_v51 = vld [vmem:[%s5030_s2 + $0x68] sm:$0xff]  ;;  %v3477_v52 = vcombine.low %v185_v37, %v189_v38 }
 0x179   :  { %2148 = vmatprep.subr.bf16.mxu1 %v3387_v62  ;;  %v416_v62 = vld [vmem:[%s5033_s5 + $0x318] sm:$0xff] }
 0x17a   :  { %v3322_v10 = vcombine.low %v416_v62, %v420_v63 }
 0x17b   :  { %2108 = vmatpush1.bf16.msra.mxu0 %v3258_v3  ;;  %v3442_v3 = vcombine.low %v536_v53, %v540_v54 }
 0x17c   :  { %2149 = vmatpush1.bf16.msra.mxu1 %v3386_v4  ;;  %2109 = vmatprep.subr.bf16.mxu0 %v3267_v5  ;;  %v3323_v4 = vcombine.high %v416_v62, %v420_v63  ;;  %v3451_v5 = vcombine.high %v544_v0, %v548_v1  ;;  %v202_v62 = vld [vmem:[%s5030_s2 + $0x88] sm:$0xff] }
 0x17d   :  { %2150 = vmatprep.subr.bf16.mxu1 %v3395_v6  ;;  %v424_v6 = vld [vmem:[%s5033_s5 + $0x358] sm:$0xff]  ;;  %v206_v63 = vld [vmem:[%s5030_s2 + $0xa8] sm:$0xff] }
 0x17e   :  { %v3330_v18 = vcombine.low %v424_v6, %v428_v7 }
 0x17f   :  { %2110 = vmatpush1.bf16.msra.mxu0 %v3266_v11  ;;  %v3450_v11 = vcombine.low %v544_v0, %v548_v1 }
 0x180   :  { %2151 = vmatpush1.bf16.msra.mxu1 %v3394_v12  ;;  %2111 = vmatprep.subr.bf16.mxu0 %v3275_v13  ;;  %v3331_v12 = vcombine.high %v424_v6, %v428_v7  ;;  %v3459_v13 = vcombine.high %v552_v8, %v556_v9  ;;  %v3495_v7 = vcombine.low %v202_v62, %v206_v63 }
 0x181   :  { %2152 = vmatprep.subr.bf16.mxu1 %v3403_v14  ;;  %v432_v14 = vld [vmem:[%s5033_s5 + $0x398] sm:$0xff] }
 0x183   :  { %2112 = vmatpush1.bf16.msra.mxu0 %v3274_v19  ;;  %v3458_v19 = vcombine.low %v552_v8, %v556_v9 }
 0x184   :  { %2153 = vmatpush1.bf16.msra.mxu1 %v3402_v23  ;;  %2113 = vmatprep.subr.bf16.mxu0 %v3283_v26  ;;  %v3339_v23 = vcombine.high %v432_v14, %v436_v15  ;;  %v3467_v26 = vcombine.high %v560_v16, %v564_v17 }
 0x185   :  { %2154 = vmatprep.subr.bf16.mxu1 %v3411_v27  ;;  %v440_v27 = vld [vmem:[%s5033_s5 + $0x3d8] sm:$0xff] }
 0x187   :  { %2114 = vmatpush1.bf16.msra.mxu0 %v3282_v32  ;;  %v572_v32 = vld [vmem:[%s5033_s5 + $0x7f8] sm:$0xff] }
 0x188   :  { %2155 = vmatpush1.bf16.msra.mxu1 %v3410_v33  ;;  %2115 = vmatprep.subr.bf16.mxu0 %v3291_v34  ;;  %v3338_v33 = vcombine.low %v432_v14, %v436_v15  ;;  %v3466_v34 = vcombine.low %v560_v16, %v564_v17  ;;  %v3475_v36 = vcombine.high %v568_v31, %v572_v32 }
 0x189   :  { %2156 = vmatprep.subr.bf16.mxu1 %v3419_v35  ;;  %v3347_v35 = vcombine.high %v440_v27, %v444_v28  ;;  %v3474_v44 = vcombine.low %v568_v31, %v572_v32  ;;  %v233_v31 = vld [vmem:[%s5030_s2 + $0x180] sm:$0xff] }
 0x18a   :  { %v237_v32 = vld [vmem:[%s5030_s2 + $0x1a0] sm:$0xff] }
 0x18b   :  { %2116 = vmatpush1.bf16.msra.mxu0 %v3290_v40  ;;  %v186_v40 = vld [vmem:[%s5030_s2 + $0x8] sm:$0xff]  ;;  %v3526_v37 = vcombine.high %v233_v31, %v237_v32 }
 0x18c   :  { %2157 = vmatpush1.bf16.msra.mxu1 %v3418_v41  ;;  %2117 = vmatprep.subr.bf16.mxu0 %v3299_v42  ;;  %v190_v41 = vld [vmem:[%s5030_s2 + $0x28] sm:$0xff]  ;;  %v4556_v42 = vld.sshfl [vmem:[%s5028_s0] sm:$0x11 pattern:$0x75316420] }
 0x18d   :  { %2158 = vmatprep.subr.bf16.mxu1 %v3427_v43  ;;  %v3346_v43 = vcombine.low %v440_v27, %v444_v28  ;;  %v3480_v46 = vcombine.high %v186_v40, %v190_v41  ;;  %v3479_v53 = vcombine.low %v186_v40, %v190_v41  ;;  %v241_v41 = vld [vmem:[%s5030_s2 + $0x1c0] sm:$0xff] }
 0x18f   :  { %2118 = vmatpush1.bf16.msra.mxu0 %v3298_v47  ;;  %v197_v47 = vld [vmem:[%s5030_s2 + $0x60] sm:$0xff] }
 0x190   :  { %2159 = vmatpush1.bf16.msra.mxu1 %v3426_v56  ;;  %2119 = vmatprep.subr.bf16.mxu0 %v3307_v48  ;;  %v2189_v56 = vcombine.high %v4556_v42, %v4556_v42  ;;  %v4567_v48 = vsub.s32 %v2192_v39, %v3934_v20  ;;  %v3486_v54 = vcombine.high %v193_v55, %v197_v47 }
 0x191   :  { %2160 = vmatprep.subr.bf16.mxu1 %v3435_v50  ;;  %v194_v50 = vld [vmem:[%s5030_s2 + $0x48] sm:$0xff]  ;;  %v3485_v0 = vcombine.low %v193_v55, %v197_v47 }
 0x192   :  { %v3487_v1 = vcombine.low %v194_v50, %v198_v51  ;;  %v242_v55 = vld [vmem:[%s5030_s2 + $0x1c8] sm:$0xff] }
 0x193   :  { %2120 = vmatpush1.bf16.msra.mxu0 %v3306_v58  ;;  %v3488_v58 = vcombine.high %v194_v50, %v198_v51  ;;  %v246_v47 = vld [vmem:[%s5030_s2 + $0x1e8] sm:$0xff] }
 0x194   :  { %2161 = vmatpush1.bf16.msra.mxu1 %v3434_v59  ;;  %2121 = vmatprep.subr.bf16.mxu0 %v3315_v60  ;;  %v201_v59 = vld [vmem:[%s5030_s2 + $0x80] sm:$0xff] }
 0x195   :  { %2162 = vmatprep.subr.bf16.mxu1 %v3443_v61  ;;  %v205_v60 = vld [vmem:[%s5030_s2 + $0xa0] sm:$0xff]  ;;  %v4582_v61 = vrot.slane %v2189_v56, %v4567_v48 }
 0x196   :  { %v3493_v6 = vcombine.low %v201_v59, %v205_v60 }
 0x197   :  { %2122 = vmatpush1.bf16.msra.mxu0 %v3314_v2  ;;  %v3494_v2 = vcombine.high %v201_v59, %v205_v60  ;;  %v3536_v60 = vcombine.high %v242_v55, %v246_v47 }
 0x198   :  { %2163 = vmatpush1.bf16.msra.mxu1 %v3442_v3  ;;  %2123 = vmatprep.subr.bf16.mxu0 %v3323_v4  ;;  %v3496_v3 = vcombine.high %v202_v62, %v206_v63  ;;  %v213_v4 = vld [vmem:[%s5030_s2 + $0xe0] sm:$0xff] }
 0x199   :  { %2164 = vmatprep.subr.bf16.mxu1 %v3451_v5  ;;  %v214_v5 = vld [vmem:[%s5030_s2 + $0xe8] sm:$0xff]  ;;  %v249_v62 = vld [vmem:[%s5030_s2 + $0x200] sm:$0xff] }
 0x19a   :  { %v253_v63 = vld [vmem:[%s5030_s2 + $0x220] sm:$0xff] }
 0x19b   :  { %2124 = vmatpush1.bf16.msra.mxu0 %v3322_v10  ;;  %v217_v10 = vld [vmem:[%s5030_s2 + $0x100] sm:$0xff] }
 0x19c   :  { %2165 = vmatpush1.bf16.msra.mxu1 %v3450_v11  ;;  %2125 = vmatprep.subr.bf16.mxu0 %v3331_v12  ;;  %v221_v11 = vld [vmem:[%s5030_s2 + $0x120] sm:$0xff]  ;;  %v218_v12 = vld [vmem:[%s5030_s2 + $0x108] sm:$0xff] }
 0x19d   :  { %2166 = vmatprep.subr.bf16.mxu1 %v3459_v13  ;;  %v222_v13 = vld [vmem:[%s5030_s2 + $0x128] sm:$0xff]  ;;  %v3510_v16 = vcombine.high %v217_v10, %v221_v11  ;;  %v3509_v27 = vcombine.low %v217_v10, %v221_v11 }
 0x19e   :  { %v3512_v17 = vcombine.high %v218_v12, %v222_v13  ;;  %v3511_v28 = vcombine.low %v218_v12, %v222_v13  ;;  %v265_v12 = vld [vmem:[%s5030_s2 + $0x280] sm:$0xff] }
 0x19f   :  { %2126 = vmatpush1.bf16.msra.mxu0 %v3330_v18  ;;  %v225_v18 = vld [vmem:[%s5030_s2 + $0x140] sm:$0xff] }
 0x1a0   :  { %2167 = vmatpush1.bf16.msra.mxu1 %v3458_v19  ;;  %2127 = vmatprep.subr.bf16.mxu0 %v3339_v23  ;;  %v229_v19 = vld [vmem:[%s5030_s2 + $0x160] sm:$0xff]  ;;  %v226_v23 = vld [vmem:[%s5030_s2 + $0x148] sm:$0xff] }
 0x1a1   :  { %2168 = vmatprep.subr.bf16.mxu1 %v3467_v26  ;;  %v230_v26 = vld [vmem:[%s5030_s2 + $0x168] sm:$0xff]  ;;  %v3518_v29 = vcombine.high %v225_v18, %v229_v19  ;;  %v269_v13 = vld [vmem:[%s5030_s2 + $0x2a0] sm:$0xff] }
 0x1a2   :  { %v3520_v30 = vcombine.high %v226_v23, %v230_v26 }
 0x1a3   :  { %2128 = vmatpush1.bf16.msra.mxu0 %v3338_v33  ;;  %v234_v33 = vld [vmem:[%s5030_s2 + $0x188] sm:$0xff] }
 0x1a4   :  { %2169 = vmatpush1.bf16.msra.mxu1 %v3466_v34  ;;  %2129 = vmatprep.subr.bf16.mxu0 %v3347_v35  ;;  %v238_v34 = vld [vmem:[%s5030_s2 + $0x1a8] sm:$0xff]  ;;  %v3517_v35 = vcombine.low %v225_v18, %v229_v19  ;;  %v3558_v18 = vcombine.high %v265_v12, %v269_v13 }
 0x1a5   :  { %2170 = vmatprep.subr.bf16.mxu1 %v3475_v36  ;;  %v3519_v36 = vcombine.low %v226_v23, %v230_v26  ;;  %v3528_v40 = vcombine.high %v234_v33, %v238_v34  ;;  %v273_v23 = vld [vmem:[%s5030_s2 + $0x2c0] sm:$0xff] }
 0x1a6   :  { %v277_v26 = vld [vmem:[%s5030_s2 + $0x2e0] sm:$0xff] }
 0x1a7   :  { %2130 = vmatpush1.bf16.msra.mxu0 %v3346_v43  ;;  %v245_v43 = vld [vmem:[%s5030_s2 + $0x1e0] sm:$0xff] }
 0x1a8   :  { %2171 = vmatpush1.bf16.msra.mxu1 %v3474_v44  ;;  %2846 = vmatprep.subr.bf16.mxu0 %v3478_v45  ;;  %v3534_v59 = vcombine.high %v241_v41, %v245_v43 }
 0x1a9   :  { %2887 = vmatprep.subr.bf16.mxu1 %v3480_v46 }
 0x1aa   :  { %2132 = vmatmul.mubr.bf16.vlgmr.msra.gmra.mrb[16].mxu0 %v3973_v57  ;;  %v209_v57 = vld [vmem:[%s5030_s2 + $0xc0] sm:$0xff] }
 0x1ab   :  { %2173 = vmatmul.mubr.bf16.vlgmr.msra.gmra.mrb[16].mxu1 %v3958_v49  ;;  %2847 = vmatpush1.bf16.msra.mxu0 %v3477_v52  ;;  %v210_v49 = vld [vmem:[%s5030_s2 + $0xc8] sm:$0xff]  ;;  %v3502_v8 = vcombine.high %v209_v57, %v213_v4  ;;  %v3501_v14 = vcombine.low %v209_v57, %v213_v4  ;;  %v3525_v52 = vcombine.low %v233_v31, %v237_v32 }
 0x1ac   :  { %2888 = vmatpush1.bf16.msra.mxu1 %v3479_v53  ;;  %2848 = vmatprep.subr.bf16.mxu0 %v3486_v54  ;;  %v3504_v9 = vcombine.high %v210_v49, %v214_v5  ;;  %v3503_v15 = vcombine.low %v210_v49, %v214_v5  ;;  %v3542_v57 = vcombine.high %v249_v62, %v253_v63  ;;  %v257_v49 = vld [vmem:[%s5030_s2 + $0x240] sm:$0xff] }
 0x1ad   :  { %2889 = vmatprep.subr.bf16.mxu1 %v3488_v58  ;;  %2878 = vmatprep.mubr.bf16.mxu0 %v4582_v61  ;;  %v3527_v58 = vcombine.low %v234_v33, %v238_v34  ;;  %v261_v5 = vld [vmem:[%s5030_s2 + $0x260] sm:$0xff]  ;;  %v3566_v31 = vcombine.high %v273_v23, %v277_v26 }
 0x1ae   :  { %2919 = vmatprep.mubr.bf16.mxu1 %v4582_v61  ;;  %v3550_v10 = vcombine.high %v257_v49, %v261_v5  ;;  %v281_v33 = vld [vmem:[%s5030_s2 + $0x300] sm:$0xff] }
 0x1af   :  { %2849 = vmatpush1.bf16.msra.mxu0 %v3485_v0  ;;  %v250_v0 = vld [vmem:[%s5030_s2 + $0x208] sm:$0xff]  ;;  %v285_v34 = vld [vmem:[%s5030_s2 + $0x320] sm:$0xff] }
 0x1b0   :  { %2890 = vmatpush1.bf16.msra.mxu1 %v3487_v1  ;;  %2850 = vmatprep.subr.bf16.mxu0 %v3494_v2  ;;  %v254_v1 = vld [vmem:[%s5030_s2 + $0x228] sm:$0xff]  ;;  %v3533_v2 = vcombine.low %v241_v41, %v245_v43  ;;  %v289_v41 = vld [vmem:[%s5030_s2 + $0x340] sm:$0xff] }
 0x1b1   :  { %2891 = vmatprep.subr.bf16.mxu1 %v3496_v3  ;;  %v3535_v3 = vcombine.low %v242_v55, %v246_v47  ;;  %v3544_v4 = vcombine.high %v250_v0, %v254_v1  ;;  %v293_v43 = vld [vmem:[%s5030_s2 + $0x360] sm:$0xff]  ;;  %v3573_v55 = vcombine.low %v281_v33, %v285_v34 }
 0x1b3   :  { %2851 = vmatpush1.bf16.msra.mxu0 %v3493_v6  ;;  %v258_v6 = vld [vmem:[%s5030_s2 + $0x248] sm:$0xff] }
 0x1b4   :  { %2892 = vmatpush1.bf16.msra.mxu1 %v3495_v7  ;;  %2852 = vmatprep.subr.bf16.mxu0 %v3502_v8  ;;  %v262_v7 = vld [vmem:[%s5030_s2 + $0x268] sm:$0xff]  ;;  %v3541_v8 = vcombine.low %v249_v62, %v253_v63 }
 0x1b5   :  { %2893 = vmatprep.subr.bf16.mxu1 %v3504_v9  ;;  %v3543_v9 = vcombine.low %v250_v0, %v254_v1  ;;  %v3552_v11 = vcombine.high %v258_v6, %v262_v7  ;;  %v305_v0 = vld [vmem:[%s5030_s2 + $0x3c0] sm:$0xff] }
 0x1b6   :  { %v309_v1 = vld [vmem:[%s5030_s2 + $0x3e0] sm:$0xff] }
 0x1b7   :  { %2853 = vmatpush1.bf16.msra.mxu0 %v3501_v14  ;;  %v266_v14 = vld [vmem:[%s5030_s2 + $0x288] sm:$0xff] }
 0x1b8   :  { %2894 = vmatpush1.bf16.msra.mxu1 %v3503_v15  ;;  %2854 = vmatprep.subr.bf16.mxu0 %v3510_v16  ;;  %v270_v15 = vld [vmem:[%s5030_s2 + $0x2a8] sm:$0xff]  ;;  %v3549_v16 = vcombine.low %v257_v49, %v261_v5  ;;  %v3598_v49 = vcombine.high %v305_v0, %v309_v1 }
 0x1b9   :  { %2895 = vmatprep.subr.bf16.mxu1 %v3512_v17  ;;  %v3551_v17 = vcombine.low %v258_v6, %v262_v7  ;;  %v3560_v19 = vcombine.high %v266_v14, %v270_v15  ;;  %v187_v6 = vld [vmem:[%s5030_s2 + $0x10] sm:$0xff] }
 0x1ba   :  { %v191_v7 = vld [vmem:[%s5030_s2 + $0x30] sm:$0xff] }
 0x1bb   :  { %2855 = vmatpush1.bf16.msra.mxu0 %v3509_v27  ;;  %v274_v27 = vld [vmem:[%s5030_s2 + $0x2c8] sm:$0xff] }
 0x1bc   :  { %2896 = vmatpush1.bf16.msra.mxu1 %v3511_v28  ;;  %2856 = vmatprep.subr.bf16.mxu0 %v3518_v29  ;;  %v278_v28 = vld [vmem:[%s5030_s2 + $0x2e8] sm:$0xff]  ;;  %v3557_v29 = vcombine.low %v265_v12, %v269_v13  ;;  %v3482_v12 = vcombine.high %v187_v6, %v191_v7 }
 0x1bd   :  { %v1887_v38 = vpop.f32.mrb[4].mxu0  ;;  %v1928_v39 = vpop.f32.mrb[4].mxu1  ;;  %2897 = vmatprep.subr.bf16.mxu1 %v3520_v30  ;;  %v3559_v30 = vcombine.low %v266_v14, %v270_v15  ;;  %v3568_v32 = vcombine.high %v274_v27, %v278_v28  ;;  %v195_v14 = vld [vmem:[%s5030_s2 + $0x50] sm:$0xff] }
 0x1be   :  { %v4648_v44 = vadd.f32 %v1928_v39, %v1887_v38  ;;  %v1889_v45 = vpop.f32.mrb[5].mxu0  ;;  %v1930_v46 = vpop.f32.mrb[5].mxu1  ;;  %v3567_v38 = vcombine.low %v274_v27, %v278_v28  ;;  %v3574_v39 = vcombine.high %v281_v33, %v285_v34  ;;  %v199_v15 = vld [vmem:[%s5030_s2 + $0x70] sm:$0xff]  ;;  %v204_v28 = vld [vmem:[%s5030_s2 + $0x98] sm:$0xff] }
 0x1bf   :  { %v4656_v56 = vadd.f32 %v1930_v46, %v1889_v45  ;;  %2857 = vmatpush1.bf16.msra.mxu0 %v3517_v35  ;;  %v1891_v50 = vpop.f32.mrb[6].mxu0  ;;  %v1932_v51 = vpop.f32.mrb[6].mxu1  ;;  %v282_v35 = vld [vmem:[%s5030_s2 + $0x308] sm:$0xff]  ;;  %v211_v34 = vld [vmem:[%s5030_s2 + $0xd0] sm:$0xff] }
 0x1c0   :  { %2898 = vmatpush1.bf16.msra.mxu1 %v3519_v36  ;;  %v1892_v53 = vpop.f32.mrb[7].mxu0  ;;  %v1933_v54 = vpop.f32.mrb[7].mxu1  ;;  %2858 = vmatprep.subr.bf16.mxu0 %v3526_v37  ;;  %v286_v36 = vld [vmem:[%s5030_s2 + $0x328] sm:$0xff]  ;;  %v3565_v37 = vcombine.low %v273_v23, %v277_v26  ;;  %v3582_v50 = vcombine.high %v289_v41, %v293_v43  ;;  %v3490_v26 = vcombine.high %v195_v14, %v199_v15 }
 0x1c1   :  { %2899 = vmatprep.subr.bf16.mxu1 %v3528_v40  ;;  %v3576_v40 = vcombine.high %v282_v35, %v286_v36  ;;  %v290_v45 = vld [vmem:[%s5030_s2 + $0x348] sm:$0xff]  ;;  %v3575_v47 = vcombine.low %v282_v35, %v286_v36  ;;  %v301_v53 = vld [vmem:[%s5030_s2 + $0x3a0] sm:$0xff]  ;;  %v215_v35 = vld [vmem:[%s5030_s2 + $0xf0] sm:$0xff] }
 0x1c2   :  { %v294_v46 = vld [vmem:[%s5030_s2 + $0x368] sm:$0xff]  ;;  %v212_v36 = vld [vmem:[%s5030_s2 + $0xd8] sm:$0xff] }
 0x1c3   :  { %2859 = vmatpush1.bf16.msra.mxu0 %v3525_v52  ;;  %v3584_v51 = vcombine.high %v290_v45, %v294_v46  ;;  %v297_v52 = vld [vmem:[%s5030_s2 + $0x380] sm:$0xff]  ;;  %v298_v54 = vld [vmem:[%s5030_s2 + $0x388] sm:$0xff] }
 0x1c4   :  { %2900 = vmatpush1.bf16.msra.mxu1 %v3527_v58  ;;  %2860 = vmatprep.subr.bf16.mxu0 %v3534_v59  ;;  %v302_v58 = vld [vmem:[%s5030_s2 + $0x3a8] sm:$0xff]  ;;  %v3581_v59 = vcombine.low %v289_v41, %v293_v43  ;;  %v3590_v62 = vcombine.high %v297_v52, %v301_v53  ;;  %v219_v43 = vld [vmem:[%s5030_s2 + $0x110] sm:$0xff] }
 0x1c5   :  { %2901 = vmatprep.subr.bf16.mxu1 %v3536_v60  ;;  %v3583_v60 = vcombine.low %v290_v45, %v294_v46  ;;  %v3592_v63 = vcombine.high %v298_v54, %v302_v58  ;;  %v223_v45 = vld [vmem:[%s5030_s2 + $0x130] sm:$0xff]  ;;  %v224_v46 = vld [vmem:[%s5030_s2 + $0x138] sm:$0xff] }
 0x1c7   :  { %2861 = vmatpush1.bf16.msra.mxu0 %v3533_v2  ;;  %v306_v2 = vld [vmem:[%s5030_s2 + $0x3c8] sm:$0xff] }
 0x1c8   :  { %2902 = vmatpush1.bf16.msra.mxu1 %v3535_v3  ;;  %2862 = vmatprep.subr.bf16.mxu0 %v3542_v57  ;;  %v310_v3 = vld [vmem:[%s5030_s2 + $0x3e8] sm:$0xff]  ;;  %v3589_v57 = vcombine.low %v297_v52, %v301_v53  ;;  %v227_v52 = vld [vmem:[%s5030_s2 + $0x150] sm:$0xff] }
 0x1c9   :  { %2903 = vmatprep.subr.bf16.mxu1 %v3544_v4  ;;  %v3591_v4 = vcombine.low %v298_v54, %v302_v58  ;;  %v3600_v5 = vcombine.high %v306_v2, %v310_v3  ;;  %v231_v53 = vld [vmem:[%s5030_s2 + $0x170] sm:$0xff]  ;;  %v228_v54 = vld [vmem:[%s5030_s2 + $0x158] sm:$0xff] }
 0x1ca   :  { %v232_v58 = vld [vmem:[%s5030_s2 + $0x178] sm:$0xff] }
 0x1cb   :  { %2863 = vmatpush1.bf16.msra.mxu0 %v3541_v8  ;;  %v188_v8 = vld [vmem:[%s5030_s2 + $0x18] sm:$0xff] }
 0x1cc   :  { %2904 = vmatpush1.bf16.msra.mxu1 %v3543_v9  ;;  %2864 = vmatprep.subr.bf16.mxu0 %v3550_v10  ;;  %v192_v9 = vld [vmem:[%s5030_s2 + $0x38] sm:$0xff]  ;;  %v3597_v10 = vcombine.low %v305_v0, %v309_v1  ;;  %v235_v0 = vld [vmem:[%s5030_s2 + $0x190] sm:$0xff] }
 0x1cd   :  { %2905 = vmatprep.subr.bf16.mxu1 %v3552_v11  ;;  %v3599_v11 = vcombine.low %v306_v2, %v310_v3  ;;  %v3484_v13 = vcombine.high %v188_v8, %v192_v9  ;;  %v3483_v23 = vcombine.low %v188_v8, %v192_v9  ;;  %v239_v1 = vld [vmem:[%s5030_s2 + $0x1b0] sm:$0xff]  ;;  %v236_v2 = vld [vmem:[%s5030_s2 + $0x198] sm:$0xff] }
 0x1ce   :  { %v240_v3 = vld [vmem:[%s5030_s2 + $0x1b8] sm:$0xff]  ;;  %v243_v8 = vld [vmem:[%s5030_s2 + $0x1d0] sm:$0xff] }
 0x1cf   :  { %2865 = vmatpush1.bf16.msra.mxu0 %v3549_v16  ;;  %v4774_v16 = vrot.slane %v4556_v42, %v4567_v48  ;;  %v203_v42 = vld [vmem:[%s5030_s2 + $0x90] sm:$0xff] }
 0x1d0   :  { %2906 = vmatpush1.bf16.msra.mxu1 %v3551_v17  ;;  %2866 = vmatprep.subr.bf16.mxu0 %v3558_v18  ;;  %v196_v17 = vld [vmem:[%s5030_s2 + $0x58] sm:$0xff]  ;;  %v207_v48 = vld [vmem:[%s5030_s2 + $0xb0] sm:$0xff] }
 0x1d1   :  { %2907 = vmatprep.subr.bf16.mxu1 %v3560_v19  ;;  %v200_v18 = vld [vmem:[%s5030_s2 + $0x78] sm:$0xff]  ;;  %v3481_v19 = vcombine.low %v187_v6, %v191_v7  ;;  %v3532_v7 = vcombine.high %v236_v2, %v240_v3  ;;  %v247_v9 = vld [vmem:[%s5030_s2 + $0x1f0] sm:$0xff] }
 0x1d2   :  { %v3492_v27 = vcombine.high %v196_v17, %v200_v18 }
 0x1d3   :  { %2867 = vmatpush1.bf16.msra.mxu0 %v3557_v29  ;;  %v208_v29 = vld [vmem:[%s5030_s2 + $0xb8] sm:$0xff] }
 0x1d4   :  { %2908 = vmatpush1.bf16.msra.mxu1 %v3559_v30  ;;  %2868 = vmatprep.subr.bf16.mxu0 %v3566_v31  ;;  %v3489_v30 = vcombine.low %v195_v14, %v199_v15  ;;  %v3491_v31 = vcombine.low %v196_v17, %v200_v18  ;;  %v3500_v33 = vcombine.high %v204_v28, %v208_v29  ;;  %v248_v14 = vld [vmem:[%s5030_s2 + $0x1f8] sm:$0xff] }
 0x1d5   :  { %2909 = vmatprep.subr.bf16.mxu1 %v3568_v32  ;;  %v3498_v32 = vcombine.high %v203_v42, %v207_v48 }
 0x1d7   :  { %2869 = vmatpush1.bf16.msra.mxu0 %v3565_v37  ;;  %v216_v37 = vld [vmem:[%s5030_s2 + $0xf8] sm:$0xff] }
 0x1d8   :  { %2910 = vmatpush1.bf16.msra.mxu1 %v3567_v38  ;;  %2870 = vmatprep.subr.bf16.mxu0 %v3574_v39  ;;  %v3497_v38 = vcombine.low %v203_v42, %v207_v48  ;;  %v3499_v39 = vcombine.low %v204_v28, %v208_v29  ;;  %v3508_v41 = vcombine.high %v212_v36, %v216_v37  ;;  %v251_v28 = vld [vmem:[%s5030_s2 + $0x210] sm:$0xff] }
 0x1d9   :  { %2911 = vmatprep.subr.bf16.mxu1 %v3576_v40  ;;  %v3506_v40 = vcombine.high %v211_v34, %v215_v35  ;;  %v3538_v42 = vcombine.high %v243_v8, %v247_v9  ;;  %v255_v29 = vld [vmem:[%s5030_s2 + $0x230] sm:$0xff] }
 0x1db   :  { %2871 = vmatpush1.bf16.msra.mxu0 %v3573_v55  ;;  %v3505_v55 = vcombine.low %v211_v34, %v215_v35  ;;  %v3546_v34 = vcombine.high %v251_v28, %v255_v29 }
 0x1dc   :  { %2912 = vmatpush1.bf16.msra.mxu1 %v3575_v47  ;;  %2872 = vmatprep.subr.bf16.mxu0 %v3582_v50  ;;  %v3507_v47 = vcombine.low %v212_v36, %v216_v37  ;;  %v3514_v50 = vcombine.high %v219_v43, %v223_v45  ;;  %v259_v36 = vld [vmem:[%s5030_s2 + $0x250] sm:$0xff] }
 0x1dd   :  { %2913 = vmatprep.subr.bf16.mxu1 %v3584_v51  ;;  %v263_v37 = vld [vmem:[%s5030_s2 + $0x270] sm:$0xff] }
 0x1df   :  { %2873 = vmatpush1.bf16.msra.mxu0 %v3581_v59  ;;  %v3513_v59 = vcombine.low %v219_v43, %v223_v45  ;;  %v3554_v43 = vcombine.high %v259_v36, %v263_v37 }
 0x1e0   :  { %2914 = vmatpush1.bf16.msra.mxu1 %v3583_v60  ;;  %2874 = vmatprep.subr.bf16.mxu0 %v3590_v62  ;;  %v3522_v62 = vcombine.high %v227_v52, %v231_v53 }
 0x1e1   :  { %2915 = vmatprep.subr.bf16.mxu1 %v3592_v63  ;;  %v3524_v63 = vcombine.high %v228_v54, %v232_v58 }
 0x1e3   :  { %2875 = vmatpush1.bf16.msra.mxu0 %v3589_v57  ;;  %v3521_v57 = vcombine.low %v227_v52, %v231_v53 }
 0x1e4   :  { %2916 = vmatpush1.bf16.msra.mxu1 %v3591_v4  ;;  %2876 = vmatprep.subr.bf16.mxu0 %v3598_v49  ;;  %v3523_v4 = vcombine.low %v228_v54, %v232_v58  ;;  %v3530_v49 = vcombine.high %v235_v0, %v239_v1  ;;  %v275_v54 = vld [vmem:[%s5030_s2 + $0x2d0] sm:$0xff] }
 0x1e5   :  { %2917 = vmatprep.subr.bf16.mxu1 %v3600_v5  ;;  %v279_v58 = vld [vmem:[%s5030_s2 + $0x2f0] sm:$0xff] }
 0x1e7   :  { %2877 = vmatpush1.bf16.msra.mxu0 %v3597_v10 }
 0x1e8   :  { %2918 = vmatpush1.bf16.msra.mxu1 %v3599_v11  ;;  %2928 = vmatprep.subr.bf16.mxu0 %v3482_v12 }
 0x1e9   :  { %2969 = vmatprep.subr.bf16.mxu1 %v3484_v13  ;;  %v244_v13 = vld [vmem:[%s5030_s2 + $0x1d8] sm:$0xff] }
 0x1ea   :  { %2879 = vmatmul.mubr.bf16.vlgmr.msra.gmra.mrb[20].mxu0 %v4774_v16  ;;  %v3540_v48 = vcombine.high %v244_v13, %v248_v14 }
 0x1eb   :  { %2920 = vmatmul.mubr.bf16.vlgmr.msra.gmra.mrb[20].mxu1 %v4774_v16  ;;  %2929 = vmatpush1.bf16.msra.mxu0 %v3481_v19  ;;  %v3529_v19 = vcombine.low %v235_v0, %v239_v1  ;;  %v3570_v0 = vcombine.high %v275_v54, %v279_v58 }
 0x1ec   :  { %2970 = vmatpush1.bf16.msra.mxu1 %v3483_v23  ;;  %2930 = vmatprep.subr.bf16.mxu0 %v3490_v26 }
 0x1ed   :  { %2971 = vmatprep.subr.bf16.mxu1 %v3492_v27  ;;  %2960 = vmatprep.mubr.bf16.mxu0 %v4582_v61  ;;  %v3531_v27 = vcombine.low %v236_v2, %v240_v3  ;;  %v283_v2 = vld [vmem:[%s5030_s2 + $0x310] sm:$0xff] }
 0x1ee   :  { %3001 = vmatprep.mubr.bf16.mxu1 %v4582_v61  ;;  %v220_v61 = vld [vmem:[%s5030_s2 + $0x118] sm:$0xff]  ;;  %v287_v3 = vld [vmem:[%s5030_s2 + $0x330] sm:$0xff] }
 0x1ef   :  { %2931 = vmatpush1.bf16.msra.mxu0 %v3489_v30  ;;  %v3516_v51 = vcombine.high %v220_v61, %v224_v46  ;;  %v3515_v60 = vcombine.low %v220_v61, %v224_v46  ;;  %v252_v30 = vld [vmem:[%s5030_s2 + $0x218] sm:$0xff]  ;;  %v267_v61 = vld [vmem:[%s5030_s2 + $0x290] sm:$0xff] }
 0x1f0   :  { %2972 = vmatpush1.bf16.msra.mxu1 %v3491_v31  ;;  %2932 = vmatprep.subr.bf16.mxu0 %v3498_v32  ;;  %v256_v31 = vld [vmem:[%s5030_s2 + $0x238] sm:$0xff]  ;;  %v3537_v32 = vcombine.low %v243_v8, %v247_v9  ;;  %v271_v46 = vld [vmem:[%s5030_s2 + $0x2b0] sm:$0xff] }
 0x1f1   :  { %2973 = vmatprep.subr.bf16.mxu1 %v3500_v33  ;;  %v3539_v33 = vcombine.low %v244_v13, %v248_v14  ;;  %v3548_v35 = vcombine.high %v252_v30, %v256_v31  ;;  %v3562_v52 = vcombine.high %v267_v61, %v271_v46  ;;  %v291_v8 = vld [vmem:[%s5030_s2 + $0x350] sm:$0xff]  ;;  %v3577_v13 = vcombine.low %v283_v2, %v287_v3 }
 0x1f2   :  { %v295_v9 = vld [vmem:[%s5030_s2 + $0x370] sm:$0xff] }
 0x1f3   :  { %2933 = vmatpush1.bf16.msra.mxu0 %v3497_v38  ;;  %v260_v38 = vld [vmem:[%s5030_s2 + $0x258] sm:$0xff] }
 0x1f4   :  { %2974 = vmatpush1.bf16.msra.mxu1 %v3499_v39  ;;  %2934 = vmatprep.subr.bf16.mxu0 %v3506_v40  ;;  %v264_v39 = vld [vmem:[%s5030_s2 + $0x278] sm:$0xff]  ;;  %v3545_v40 = vcombine.low %v251_v28, %v255_v29 }
 0x1f5   :  { %2975 = vmatprep.subr.bf16.mxu1 %v3508_v41  ;;  %v3547_v41 = vcombine.low %v252_v30, %v256_v31  ;;  %v3556_v45 = vcombine.high %v260_v38, %v264_v39  ;;  %v307_v30 = vld [vmem:[%s5030_s2 + $0x3d0] sm:$0xff] }
 0x1f6   :  { %v311_v31 = vld [vmem:[%s5030_s2 + $0x3f0] sm:$0xff] }
 0x1f7   :  { %2935 = vmatpush1.bf16.msra.mxu0 %v3505_v55  ;;  %v268_v55 = vld [vmem:[%s5030_s2 + $0x298] sm:$0xff] }
 0x1f8   :  { %2976 = vmatpush1.bf16.msra.mxu1 %v3507_v47  ;;  %2936 = vmatprep.subr.bf16.mxu0 %v3514_v50  ;;  %v272_v47 = vld [vmem:[%s5030_s2 + $0x2b8] sm:$0xff]  ;;  %v3553_v50 = vcombine.low %v259_v36, %v263_v37  ;;  %v3602_v36 = vcombine.high %v307_v30, %v311_v31 }
 0x1f9   :  { %2977 = vmatprep.subr.bf16.mxu1 %v3516_v51  ;;  %v3555_v51 = vcombine.low %v260_v38, %v264_v39  ;;  %v3564_v53 = vcombine.high %v268_v55, %v272_v47  ;;  %v3601_v38 = vcombine.low %v307_v30, %v311_v31 }
 0x1fb   :  { %2937 = vmatpush1.bf16.msra.mxu0 %v3513_v59  ;;  %v276_v59 = vld [vmem:[%s5030_s2 + $0x2d8] sm:$0xff] }
 0x1fc   :  { %2978 = vmatpush1.bf16.msra.mxu1 %v3515_v60  ;;  %2938 = vmatprep.subr.bf16.mxu0 %v3522_v62  ;;  %v280_v60 = vld [vmem:[%s5030_s2 + $0x2f8] sm:$0xff]  ;;  %v3561_v62 = vcombine.low %v267_v61, %v271_v46 }
 0x1fd   :  { %v1969_v5 = vpop.f32.mrb[8].mxu0  ;;  %v2010_v6 = vpop.f32.mrb[8].mxu1  ;;  %2979 = vmatprep.subr.bf16.mxu1 %v3524_v63  ;;  %v3563_v63 = vcombine.low %v268_v55, %v272_v47  ;;  %v3572_v1 = vcombine.high %v276_v59, %v280_v60 }
 0x1fe   :  { %v4852_v10 = vadd.f32 %v2010_v6, %v1969_v5  ;;  %v1971_v11 = vpop.f32.mrb[9].mxu0  ;;  %v2012_v12 = vpop.f32.mrb[9].mxu1  ;;  %v3571_v5 = vcombine.low %v276_v59, %v280_v60  ;;  %v3578_v6 = vcombine.high %v283_v2, %v287_v3  ;;  %v3645_v2 = vmov 1983009808  }
 0x1ff   :  { %v4860_v15 = vadd.f32 %v2012_v12, %v1971_v11  ;;  %v1973_v17 = vpop.f32.mrb[10].mxu0  ;;  %v2014_v18 = vpop.f32.mrb[10].mxu1  ;;  %2939 = vmatpush1.bf16.msra.mxu0 %v3521_v57  ;;  %v284_v57 = vld [vmem:[%s5030_s2 + $0x318] sm:$0xff]  ;;  %v3071_v3 = vunpack.c.l.s4 %v3645_v2 }
 0x200   :  { %2980 = vmatpush1.bf16.msra.mxu1 %v3523_v4  ;;  %v1974_v23 = vpop.f32.mrb[11].mxu0  ;;  %v2015_v26 = vpop.f32.mrb[11].mxu1  ;;  %2940 = vmatprep.subr.bf16.mxu0 %v3530_v49  ;;  %v288_v4 = vld [vmem:[%s5030_s2 + $0x338] sm:$0xff]  ;;  %v3569_v49 = vcombine.low %v275_v54, %v279_v58  ;;  %v3586_v17 = vcombine.high %v291_v8, %v295_v9 }
 0x201   :  { %2981 = vmatprep.subr.bf16.mxu1 %v3532_v7  ;;  %v3580_v7 = vcombine.high %v284_v57, %v288_v4  ;;  %v292_v11 = vld [vmem:[%s5030_s2 + $0x358] sm:$0xff]  ;;  %v3579_v14 = vcombine.low %v284_v57, %v288_v4  ;;  %v303_v23 = vld [vmem:[%s5030_s2 + $0x3b0] sm:$0xff]  ;;  %v4974_v57 = vld [vmem:[%s5035_s7] sm:$0xff] }
 0x202   :  { %v296_v12 = vld [vmem:[%s5030_s2 + $0x378] sm:$0xff] }
 0x203   :  { %2941 = vmatpush1.bf16.msra.mxu0 %v3529_v19  ;;  %v3588_v18 = vcombine.high %v292_v11, %v296_v12  ;;  %v299_v19 = vld [vmem:[%s5030_s2 + $0x390] sm:$0xff]  ;;  %v300_v26 = vld [vmem:[%s5030_s2 + $0x398] sm:$0xff] }
 0x204   :  { %2982 = vmatpush1.bf16.msra.mxu1 %v3531_v27  ;;  %2942 = vmatprep.subr.bf16.mxu0 %v3538_v42  ;;  %v304_v27 = vld [vmem:[%s5030_s2 + $0x3b8] sm:$0xff]  ;;  %v3585_v42 = vcombine.low %v291_v8, %v295_v9  ;;  %v3594_v28 = vcombine.high %v299_v19, %v303_v23  ;;  %v3111_v9 = vrot.slane %v4974_v57, %v3937_v21 }
 0x205   :  { %2983 = vmatprep.subr.bf16.mxu1 %v3540_v48  ;;  %v3587_v48 = vcombine.low %v292_v11, %v296_v12  ;;  %v3596_v29 = vcombine.high %v300_v26, %v304_v27 }
 0x207   :  { %2943 = vmatpush1.bf16.msra.mxu0 %v3537_v32  ;;  %v308_v32 = vld [vmem:[%s5030_s2 + $0x3d8] sm:$0xff] }
 0x208   :  { %2984 = vmatpush1.bf16.msra.mxu1 %v3539_v33  ;;  %2944 = vmatprep.subr.bf16.mxu0 %v3546_v34  ;;  %v312_v33 = vld [vmem:[%s5030_s2 + $0x3f8] sm:$0xff]  ;;  %v3593_v34 = vcombine.low %v299_v19, %v303_v23  ;;  %v3115_v19 = vrot.slane %v4974_v57, %v3946_v24 }
 0x209   :  { %2985 = vmatprep.subr.bf16.mxu1 %v3548_v35  ;;  %v3595_v35 = vcombine.low %v300_v26, %v304_v27  ;;  %v3604_v37 = vcombine.high %v308_v32, %v312_v33  ;;  %v3603_v39 = vcombine.low %v308_v32, %v312_v33 }
 0x20b   :  { %2945 = vmatpush1.bf16.msra.mxu0 %v3545_v40 }
 0x20c   :  { %2986 = vmatpush1.bf16.msra.mxu1 %v3547_v41  ;;  %2946 = vmatprep.subr.bf16.mxu0 %v3554_v43 }
 0x20d   :  { %2987 = vmatprep.subr.bf16.mxu1 %v3556_v45 }
 0x20f   :  { %2947 = vmatpush1.bf16.msra.mxu0 %v3553_v50 }
 0x210   :  { %2988 = vmatpush1.bf16.msra.mxu1 %v3555_v51  ;;  %2948 = vmatprep.subr.bf16.mxu0 %v3562_v52 }
 0x211   :  { %2989 = vmatprep.subr.bf16.mxu1 %v3564_v53 }
 0x213   :  { %2949 = vmatpush1.bf16.msra.mxu0 %v3561_v62 }
 0x214   :  { %2990 = vmatpush1.bf16.msra.mxu1 %v3563_v63  ;;  %2950 = vmatprep.subr.bf16.mxu0 %v3570_v0 }
 0x215   :  { %2991 = vmatprep.subr.bf16.mxu1 %v3572_v1  ;;  %v3010_v1 = vld [vmem:[%s5034_s6] sm:$0xff]  ;;  %s3646_s6 = smov [#allocation3]  }
 0x216   :  { %v3015_v4 = vrot.slane %v3010_v1, %v3937_v21  ;;  %s3200_s7 = sshll.u32 %s3646_s6, 4  ;;  %s3201_s7 = int_to_ptr.vmem [resolvable:$true] %s3200_s7 }
 0x217   :  { %2951 = vmatpush1.bf16.msra.mxu0 %v3569_v49  ;;  %s3619_s15 = scalar_lea.vmem %s3201_s7, 256  ;;  %p3624_p1 = scmp.lt.s32.totalorder %s3201_s7, %s3201_s7 }
 0x218   :  { %2992 = vmatpush1.bf16.msra.mxu1 %v3571_v5  ;;  %2952 = vmatprep.subr.bf16.mxu0 %v3578_v6  ;;  %v3023_v5 = vrot.slane %v3010_v1, %v3940_v22  ;;  %v3019_v6 = vrot.slane %v3010_v1, %v3946_v24  ;;  %p3620_p0 = scmp.ne.s32.totalorder %s3201_s7, %s3619_s15  ;;  %p3625_p2 = scmp.lt.s32.totalorder %s3619_s15, %s3619_s15 }
 0x219   :  { %2993 = vmatprep.subr.bf16.mxu1 %v3580_v7  ;;  %v3072_v7 = vunpack.c.0.s8 %v3071_v3 }
 0x21a   :  { %p3626_p3 = por %p3625_p2, %p3624_p1 }
 0x21b   :  { %2953 = vmatpush1.bf16.msra.mxu0 %v3577_v13  ;;  %v3027_v13 = vrot.slane %v3010_v1, %v3949_v25 }
 0x21c   :  { %2994 = vmatpush1.bf16.msra.mxu1 %v3579_v14  ;;  %2954 = vmatprep.subr.bf16.mxu0 %v3586_v17  ;;  %v3119_v17 = vrot.slane %v4974_v57, %v3940_v22  ;;  %v3075_v22 = vsub.s32 %v3072_v7, %v3934_v20  ;;  %p3627_p4 = pnand %p3626_p3, %p3620_p0 }
 0x21d   :  { %2995 = vmatprep.subr.bf16.mxu1 %v3588_v18 }
 0x21f   :  { %2955 = vmatpush1.bf16.msra.mxu0 %v3585_v42 }
 0x220   :  { %2996 = vmatpush1.bf16.msra.mxu1 %v3587_v48  ;;  %2956 = vmatprep.subr.bf16.mxu0 %v3594_v28 }
 0x221   :  { %2997 = vmatprep.subr.bf16.mxu1 %v3596_v29 }
 0x223   :  { %2957 = vmatpush1.bf16.msra.mxu0 %v3593_v34 }
 0x224   :  { %2998 = vmatpush1.bf16.msra.mxu1 %v3595_v35  ;;  %2958 = vmatprep.subr.bf16.mxu0 %v3602_v36 }
 0x225   :  { %2999 = vmatprep.subr.bf16.mxu1 %v3604_v37 }
 0x227   :  { %2959 = vmatpush1.bf16.msra.mxu0 %v3601_v38 }
 0x228   :  { %3000 = vmatpush1.bf16.msra.mxu1 %v3603_v39 }
 0x22a   :  { %2961 = vmatmul.mubr.bf16.vlgmr.msra.gmra.mrb[24].mxu0 %v4774_v16 }
 0x22b   :  { %3002 = vmatmul.mubr.bf16.vlgmr.msra.gmra.mrb[24].mxu1 %v4774_v16 }
 0x23d   :  { %v2051_v40 = vpop.f32.mrb[12].mxu0 }
 0x23e   :  { %v2092_v41 = vpop.f32.mrb[12].mxu1  ;;  %v2053_v43 = vpop.f32.mrb[13].mxu0 }
 0x23f   :  { %v4960_v45 = vadd.f32 %v2092_v41, %v2051_v40  ;;  %v2094_v61 = vpop.f32.mrb[13].mxu1  ;;  %v2055_v46 = vpop.f32.mrb[14].mxu0 }
 0x240   :  { %v4962_v55 = vadd.f32 %v2094_v61, %v2053_v43  ;;  %v2096_v47 = vpop.f32.mrb[14].mxu1  ;;  %v2056_v50 = vpop.f32.mrb[15].mxu0  ;;  %v3030_v61 = vsub.s32 4, %v3934_v20  ;;  %v3038_v46 = vsub.s32 6, %v3934_v20 }
 0x241   :  { %v2097_v51 = vpop.f32.mrb[15].mxu1  ;;  %v3034_v47 = vsub.s32 5, %v3934_v20  ;;  %v3042_v50 = vsub.s32 7, %v3934_v20 }
 0x242   :  { %v3031_v51 = vrot.slane %v3010_v1, %v3030_v61 }
 0x27d   :  { %v2133_v52 = vpop.f32.mrb[16].mxu0 }
 0x27e   :  { %v2174_v53 = vpop.f32.mrb[16].mxu1  ;;  %v2135_v54 = vpop.f32.mrb[17].mxu0 }
 0x27f   :  { %v4964_v58 = vadd.f32 %v2174_v53, %v2133_v52  ;;  %v2176_v59 = vpop.f32.mrb[17].mxu1  ;;  %v2137_v60 = vpop.f32.mrb[18].mxu0  ;;  %v3039_v53 = vrot.slane %v3010_v1, %v3038_v46 }
 0x280   :  { %v4966_v16 = vadd.f32 %v2176_v59, %v2135_v54  ;;  %v2178_v62 = vpop.f32.mrb[18].mxu1  ;;  %v2138_v63 = vpop.f32.mrb[19].mxu0  ;;  %v3035_v54 = vrot.slane %v3010_v1, %v3034_v47  ;;  %v3127_v60 = vrot.slane %v4974_v57, %v3030_v61 }
 0x281   :  { %v2179_v0 = vpop.f32.mrb[19].mxu1 }
 0x282   :  { %v3043_v0 = vrot.slane %v3010_v1, %v3042_v50 }
 0x2bd   :  { %v2880_v49 = vpop.f32.mrb[20].mxu0 }
 0x2be   :  { %v2881_v8 = vadd.f32 %v2880_v49, %v4648_v44  ;;  %v2921_v11 = vpop.f32.mrb[20].mxu1  ;;  %v2882_v12 = vpop.f32.mrb[21].mxu0 }
 0x2bf   :  { %v2922_v14 = vadd.f32 %v2921_v11, %v4852_v10  ;;  %v2883_v18 = vadd.f32 %v2882_v12, %v4656_v56  ;;  %v2923_v23 = vpop.f32.mrb[21].mxu1  ;;  %v2884_v26 = vpop.f32.mrb[22].mxu0  ;;  %v3123_v10 = vrot.slane %v4974_v57, %v3949_v25 }
 0x2c0   :  { %v3052_v44 = vadd.f32 %v3015_v4, %v2881_v8  ;;  %v2924_v21 = vadd.f32 %v2923_v23, %v4860_v15  ;;  %v2885_v27 = vpop.f32.mrb[23].mxu0  ;;  %v2925_v42 = vpop.f32.mrb[22].mxu1  ;;  %v3131_v4 = vrot.slane %v4974_v57, %v3034_v47 }
 0x2c1   :  { %v3054_v48 = vadd.f32 %v3023_v5, %v2922_v14  ;;  %v3053_v28 = vadd.f32 %v3019_v6, %v2883_v18  ;;  %v2926_v29 = vpop.f32.mrb[23].mxu1  ;;  %v3135_v6 = vrot.slane %v4974_v57, %v3038_v46 }
 0x2c2   :  { %v3148_v56 = vmul.f32 %v3111_v9, %v3052_v44  ;;  %v3055_v30 = vadd.f32 %v3027_v13, %v2924_v21  ;;  %v3605_v29 = vld [vmem:[#allocation2] ss:$0 sm:$0xff] }
 0x2c3   :  { %v3150_v31 = vmul.f32 %v3119_v17, %v3054_v48  ;;  %v3068_v24 = vcombine.low %v3052_v44, %v3053_v28  ;;  %v3149_v32 = vmul.f32 %v3115_v19, %v3053_v28 }
 0x2c4   :  { %v3157_v33 = vsel %vm3156_vm6, %v3148_v56, 0.0  ;;  %v3069_v34 = vcombine.low %v3054_v48, %v3055_v30  ;;  %v3151_v35 = vmul.f32 %v3123_v10, %v3055_v30 }
 0x2c5   :  { %v3158_v15 = vsel %vm3156_vm6, %v3149_v32, 0.0  ;;  %v3076_v36 = vrot.slane %v3068_v24, %v3075_v22  ;;  %v3160_v39 = vsel %vm3156_vm6, %v3150_v31, 0.0 }
 0x2c6   :  { %v3159_v37 = vadd.f32 %v3158_v15, %v3157_v33  ;;  %v3083_v38 = vrot.slane %v3069_v34, %v3075_v22  ;;  %v3162_v41 = vsel %vm3156_vm6, %v3151_v35, 0.0 }
 0x2c8   :  { %v3161_v25 = vadd.f32 %v3160_v39, %v3159_v37  ;;  %v3084_v40 = vcombine.low %v3076_v36, %v3083_v38 }
 0x2ca   :  { %v3163_v43 = vadd.f32 %v3162_v41, %v3161_v25  ;;  %3104 = vst [vmem:[#allocation3] sm:$0xff] %v3084_v40 }
 0x2fd   :  { %v2962_v52 = vpop.f32.mrb[24].mxu0 }
 0x2fe   :  { %v2963_v59 = vadd.f32 %v2962_v52, %v4960_v45  ;;  %v3003_v62 = vpop.f32.mrb[24].mxu1  ;;  %v2964_v63 = vpop.f32.mrb[25].mxu0 }
 0x2ff   :  { %v3004_v2 = vadd.f32 %v3003_v62, %v4964_v58  ;;  %v2965_v3 = vadd.f32 %v2964_v63, %v4962_v55  ;;  %v3005_v49 = vpop.f32.mrb[25].mxu1  ;;  %v2966_v5 = vpop.f32.mrb[26].mxu0  ;;  %v3139_v58 = vrot.slane %v4974_v57, %v3042_v50 }
 0x300   :  { %v3056_v20 = vadd.f32 %v3031_v51, %v2963_v59  ;;  %v3006_v7 = vadd.f32 %v3005_v49, %v4966_v16  ;;  %v2967_v8 = vpop.f32.mrb[27].mxu0  ;;  %v3007_v45 = vpop.f32.mrb[26].mxu1 }
 0x301   :  { %v3058_v9 = vadd.f32 %v3039_v53, %v3004_v2  ;;  %v3057_v11 = vadd.f32 %v3035_v54, %v2965_v3  ;;  %v3008_v12 = vpop.f32.mrb[27].mxu1 }
 0x302   :  { %v3152_v13 = vmul.f32 %v3127_v60, %v3056_v20  ;;  %v3059_v1 = vadd.f32 %v3043_v0, %v3006_v7 }
 0x303   :  { %v3085_v14 = vcombine.low %v3056_v20, %v3057_v11  ;;  %v3153_v55 = vmul.f32 %v3131_v4, %v3057_v11  ;;  %v3154_v18 = vmul.f32 %v3135_v6, %v3058_v9 }
 0x304   :  { %v3164_v17 = vsel %vm3156_vm6, %v3152_v13, 0.0  ;;  %v3086_v19 = vcombine.low %v3058_v9, %v3059_v1  ;;  %v3155_v16 = vmul.f32 %v3139_v58, %v3059_v1 }
 0x305   :  { %v3165_v23 = vadd.f32 %v3164_v17, %v3163_v43  ;;  %v3166_v26 = vsel %vm3156_vm6, %v3153_v55, 0.0  ;;  %v3093_v44 = vrot.slane %v3085_v14, %v3075_v22  ;;  %v3168_v42 = vsel %vm3156_vm6, %v3154_v18, 0.0 }
 0x306   :  { %v3100_v21 = vrot.slane %v3086_v19, %v3075_v22  ;;  %v3170_v10 = vsel %vm3156_vm6, %v3155_v16, 0.0 }
 0x307   :  { %v3167_v27 = vadd.f32 %v3166_v26, %v3165_v23 }
 0x308   :  { %v3101_v48 = vcombine.low %v3093_v44, %v3100_v21 }
 0x309   :  { %v3169_v28 = vadd.f32 %v3168_v42, %v3167_v27 }
 0x30a   :  { %3105 = vst [vmem:[#allocation3 + $0x8] sm:$0xff] %v3101_v48 }
 0x30b   :  { %v3171_v57 = vadd.f32 %v3170_v10, %v3169_v28 }
 0x30d   :  { %3172 = vadd.xlane.f32.xlu0 %v3171_v57 }
 0x39a   :  { %v3173_v56 = vpop.xlane.xlu0 %3172 }
 0x39b   :  { %v3181_v30 = vadd.f32 %v3605_v29, %v3173_v56 }
 0x39d   :  { %v3182_v31 = vsub.f32 0.0, %v3181_v30 }
 0x39f   :  { %v3183_v24 = vmul.f32 1.442695, %v3182_v31 }
 0x3a1   :  { %3615 = vpow2.f32 %v3183_v24 }
 0x3ab   :  { %v3616_v32 = vpop.eup %3615 }
 0x3ac   :  { %v3185_v33 = vadd.f32 1.0, %v3616_v32 }
 0x3ae   :  { %3617 = vrcp.f32 %v3185_v33 }
 0x3b8   :  { %v3618_v22 = vpop.eup %3617 }
 0x3b9   :  { %3190 = vperm.xlu0 %3610, %v3618_v22  }
 0x3ba   :  { %3630 = shalt.err (!%p3627_p4)
}
 0x3bb   :  { %s3631_s18 = scalar_lea.hbm %s5037_s9, 256 }
 0x3bc   :  { %p3632_p5 = scmp.ne.s32.totalorder %s5037_s9, %s3631_s18  ;;  %p3635_p6 = scmp.lt.u32.totalorder %s3631_s18, %s5037_s9 }
 0x3be   :  { %p3637_p7 = pnand %p3635_p6, %p3632_p5 }
 0x3c0   :  { %3640 = shalt.err (!%p3637_p7)
}
 0x3c1   :  { %3203 = dma.vmem_to_hbm [thread:$0]  %s3201_s7, 256, %s5037_s9, [#allocation4]  }
 0x438   :  { %v3191_v34 = vpop.permute.xlu0 %3190 }
 0x439   :  { %3193 = vst [vmem:[%s5038_s10] sm:$0x3] %v3191_v34 }
 0x43a   :  { %3641 = dma.done.wait [#allocation4], 256  }
 0x43b   :  { %3642 = vsyncadd [#allocation4], 4294967040 }
 0x43c   :  { %3211 = vsyncpa [#allocation4], 1 }

</bundles_post_ra>
